<compile_context>
chip_gen: v6e
topology: v6e:2x2x1
jax: 0.10.0
libtpu: 0.0.40
codegen_flags: <defaults>
</compile_context>

<pallas_src>
import math

import jax
import jax.numpy as jnp
from jax import lax
from jax.experimental import pallas as pl
from jax.experimental.pallas import tpu as pltpu

_BN_EPS = 1e-5
_LANES = 128  # working channel width inside the kernel (vreg lane width)

# (kernel_size, stride, padding) for the 5 conv+BN+ReLU blocks.
_LAYER_CFG = ((3, 1, 0), (3, 1, 1), (4, 2, 1), (3, 1, 1), (3, 1, 1))


# --------------------------------------------------------------------------
# In-kernel helpers (operate on values, not refs)
# --------------------------------------------------------------------------
def _bn_relu(acc, gamma, beta):
    """Training-mode BatchNorm1d (biased stats over all B*Lout rows) + ReLU.

    Two-pass statistics in f32 for stability.  acc: (N, 128) f32.
    gamma/beta are zero-padded beyond the real channel count, which keeps the
    padded lanes exactly zero through normalization + affine + ReLU.
    """
    n = acc.shape[0]
    mean = acc.sum(axis=0, keepdims=True) * (1.0 / n)
    d = acc - mean
    var = (d * d).sum(axis=0, keepdims=True) * (1.0 / n)
    y = d * (lax.rsqrt(var + _BN_EPS) * gamma) + beta
    return jnp.maximum(y, 0.0)


def _im2col(h, K, stride, pad):
    """Build the im2col slab for one conv layer.

    h: (B, L, 128) f32 activation.  Returns ((B*Lout, K*128) f32, Lout).
    The K shifted slabs are concatenated along the lane axis at 128-aligned
    offsets, so the whole conv becomes a single matmul against the
    (K*128, 128) concatenated weight.
    """
    B, L, C = h.shape
    if pad:
        z = jnp.zeros((B, pad, C), h.dtype)
        h = jnp.concatenate([z, h, z], axis=1)
    Lp = L + 2 * pad
    Lout = (Lp - K) // stride + 1
    if stride == 1:
        slabs = [h[:, k:k + Lout, :] for k in range(K)]
    else:
        # stride == 2: even/odd de-interleave via reshape (no strided slices).
        assert stride == 2 and Lp % 2 == 0, (stride, Lp)
        hr = h.reshape(B, Lp // 2, 2, C)
        # output i uses padded row 2*i + k -> slab parity k%2, offset k//2
        slabs = [hr[:, k // 2:k // 2 + Lout, k % 2, :] for k in range(K)]
    xcat = jnp.concatenate(slabs, axis=-1)          # (B, Lout, K*128)
    return xcat.reshape(B * Lout, K * C), Lout


# --------------------------------------------------------------------------
# Fused encoder kernel
# --------------------------------------------------------------------------
def encoder_kernel(x0_ref, *refs):
    """Fully fused encoder: 5x (conv + BN + ReLU) + final 1x1 conv with bias.

    x0_ref: (B, L0out, R0) bf16 — wrapper-built im2col patches for layer 0.
    refs  : [w0,g0,b0, w1,g1,b1, ..., w4,g4,b4, w5, bias5, o_ref]
            w0: (R0, 128) bf16; w1..w4: (K*128, 128) bf16; w5: (128, 128) bf16
            g*/b*/bias5: (1, 128) f32 (zero-padded beyond real channels)
    o_ref : (B, Lout, emb) f32 — narrow output, channel strip fused here.
    """
    o_ref = refs[-1]
    p = refs[:-1]

    B, L0out, R0 = x0_ref.shape

    # ---- Layer 0: conv(k3, s1, p0) as one matmul over pre-built patches ----
    acc = jnp.dot(x0_ref[...].reshape(B * L0out, R0), p[0][...],
                  preferred_element_type=jnp.float32)
    h = _bn_relu(acc, p[1][...], p[2][...]).reshape(B, L0out, _LANES)

    # ---- Layers 1..4: im2col (lane-aligned concat) + single matmul each ----
    idx = 3
    for (K, stride, pad) in _LAYER_CFG[1:]:
        w = p[idx][...]                 # (K*128, 128) bf16
        gamma = p[idx + 1][...]         # (1, 128) f32
        beta = p[idx + 2][...]
        idx += 3
        xcat, Lout = _im2col(h, K, stride, pad)
        acc = jnp.dot(xcat.astype(jnp.bfloat16), w,
                      preferred_element_type=jnp.float32)
        h = _bn_relu(acc, gamma, beta).reshape(B, Lout, _LANES)

    # ---- Final 1x1 conv with bias (no BN / ReLU), strip padded channels ----
    w5 = p[idx][...]                    # (128, 128) bf16
    b5 = p[idx + 1][...]                # (1, 128) f32
    Bc, L, C = h.shape
    z = jnp.dot(h.reshape(Bc * L, C).astype(jnp.bfloat16), w5,
                preferred_element_type=jnp.float32) + b5
    emb = o_ref.shape[2]
    o_ref[...] = z[:, :emb].reshape(Bc, L, emb)


# --------------------------------------------------------------------------
# Wrapper
# --------------------------------------------------------------------------
def _full_spec(shape):
    # grid=(1,): whole array resides in VMEM as a single block.
    return pl.BlockSpec(shape, lambda i: (0,) * len(shape))


def _pad_vec(v):
    """(C,) -> (1, 128) f32, zero-padded (padded lanes must stay zero)."""
    v = v.reshape(1, -1).astype(jnp.float32)
    return jnp.pad(v, ((0, 0), (0, _LANES - v.shape[1])))


def _vmem_budget(B, L):
    rows = B * (L + 2)
    # f32 im2col (rows, 4*128) + bf16 copy + acc/h temporaries + weights,
    # generous headroom; floor 16 MiB (<= every chip's default scoped limit).
    est = rows * (4 * _LANES) * 4 * 4 + (8 << 20)
    return int(min(max(est, 16 << 20), 100 << 20))


def encoder_forward(params, x_ncl):
    """x_ncl: (B, in_channels, L) as in PyTorch. Returns (B, embedding_dim, Lout)."""
    B, Cin, L = x_ncl.shape
    emb = params["conv5_b"].shape[0]

    # channels-last; input is consumed only by layer 0's im2col below.
    x = jnp.transpose(x_ncl, (0, 2, 1)).astype(jnp.float32)   # (B, L, Cin)

    # ---- Layer-0 im2col built wrapper-side (Cin is tiny) ----
    K0, s0, p0 = _LAYER_CFG[0]
    L0 = (L + 2 * p0 - K0) // s0 + 1
    if p0:
        x = jnp.pad(x, ((0, 0), (p0, p0), (0, 0)))
    x0 = jnp.concatenate([x[:, k:k + L0, :] for k in range(K0)], axis=-1)
    r0 = K0 * Cin
    R0 = max(16, -(-r0 // 16) * 16)                           # round up to 16
    x0 = jnp.pad(x0, ((0, 0), (0, 0), (0, R0 - r0))).astype(jnp.bfloat16)

    args = [x0]

    # layer 0 concatenated weight: (K0, Cin, C) -> (K0*Cin, C) -> (R0, 128)
    w0 = params["conv0_w"].astype(jnp.float32).reshape(r0, -1)
    w0 = jnp.pad(w0, ((0, R0 - r0), (0, _LANES - w0.shape[1])))
    args += [w0.astype(jnp.bfloat16),
             _pad_vec(params["bn0_gamma"]), _pad_vec(params["bn0_beta"])]

    # layers 1..4: pad per-tap (Cin, Cout) -> (128, 128), fold taps into rows.
    for i in range(1, 5):
        w = params[f"conv{i}_w"].astype(jnp.float32)          # (K, C, C)
        K, Ci, Co = w.shape
        w = jnp.pad(w, ((0, 0), (0, _LANES - Ci), (0, _LANES - Co)))
        w = w.reshape(K * _LANES, _LANES)
        args += [w.astype(jnp.bfloat16),
                 _pad_vec(params[f"bn{i}_gamma"]), _pad_vec(params[f"bn{i}_beta"])]

    # final 1x1 conv: (1, C, emb) -> (128, 128) (strip happens in-kernel)
    w5 = params["conv5_w"].astype(jnp.float32)[0]             # (C, emb)
    w5 = jnp.pad(w5, ((0, _LANES - w5.shape[0]), (0, _LANES - w5.shape[1])))
    args += [w5.astype(jnp.bfloat16), _pad_vec(params["conv5_b"])]

    # Static output length + cost estimate.
    rows_list = [R0] + [K * _LANES for (K, _, _) in _LAYER_CFG[1:]]
    flops = 0
    Lout = L
    for (K, s, pd), r in zip(_LAYER_CFG, rows_list):
        Lout = (Lout + 2 * pd - K) // s + 1
        flops += 2 * B * Lout * r * _LANES
    flops += 2 * B * Lout * _LANES * _LANES
    bytes_accessed = sum(math.prod(a.shape) * a.dtype.itemsize for a in args)
    bytes_accessed += B * Lout * emb * 4

    out = pl.pallas_call(
        encoder_kernel,
        grid=(1,),
        out_shape=jax.ShapeDtypeStruct((B, Lout, emb), jnp.float32),
        in_specs=[_full_spec(a.shape) for a in args],
        out_specs=_full_spec((B, Lout, emb)),
        compiler_params=pltpu.CompilerParams(
            dimension_semantics=("arbitrary",),
            vmem_limit_bytes=_vmem_budget(B, L)),
        cost_estimate=pl.CostEstimate(flops=int(flops),
                                      transcendentals=5 * _LANES,
                                      bytes_accessed=int(bytes_accessed)),
    )(*args)

    return jnp.transpose(out, (0, 2, 1))  # back to (B, emb, Lout)


# --------------------------------------------------------------------------
# Parameter init (PyTorch-like shapes/logic; weight layout is (K, Cin, Cout))
# --------------------------------------------------------------------------
def init_params(key, in_channels, channels, embedding_dim):
    params = {}
    keys = jax.random.split(key, 7)
    shapes = [
        (3, in_channels, channels),
        (3, channels, channels),
        (4, channels, channels),
        (3, channels, channels),
        (3, channels, channels),
    ]
    for i, (K, ci, co) in enumerate(shapes):
        scale = 1.0 / jnp.sqrt(float(ci * K))
        params[f"conv{i}_w"] = scale * jax.random.normal(keys[i], (K, ci, co), jnp.float32)
        params[f"bn{i}_gamma"] = jnp.ones((co,), jnp.float32)   # PyTorch BN init
        params[f"bn{i}_beta"] = jnp.zeros((co,), jnp.float32)
    scale = 1.0 / jnp.sqrt(float(channels))
    params["conv5_w"] = scale * jax.random.normal(
        keys[5], (1, channels, embedding_dim), jnp.float32)
    params["conv5_b"] = 0.1 * jax.random.normal(keys[6], (embedding_dim,), jnp.float32)
    return params


if __name__ == "__main__":
    B, in_channels, L = 2, 4, 16
    channels, embedding_dim = 32, 16

    key = jax.random.PRNGKey(0)
    k_x, k_p = jax.random.split(key)
    x = jax.random.normal(k_x, (B, in_channels, L), jnp.float32)
    params = init_params(k_p, in_channels, channels, embedding_dim)

    out = jax.jit(encoder_forward)(params, x)
    out = jax.block_until_ready(out)

    # L=16 -> 14 (k3,p0) -> 14 -> 7 (k4,s2,p1) -> 7 -> 7 -> 7
    assert out.shape == (B, embedding_dim, 7), out.shape
    assert bool(jnp.all(jnp.isfinite(out)))
    print("KERNEL_OK")
</pallas_src>

<mosaic_0001>
module attributes {stable_mosaic.version = 11 : i64} {
  func.func @encoder_kernel(%arg0: i32, %arg1: memref<2x14x16xbf16, #tpu.memory_space<vmem>>, %arg2: memref<16x128xbf16, #tpu.memory_space<vmem>>, %arg3: memref<1x128xf32, #tpu.memory_space<vmem>>, %arg4: memref<1x128xf32, #tpu.memory_space<vmem>>, %arg5: memref<384x128xbf16, #tpu.memory_space<vmem>>, %arg6: memref<1x128xf32, #tpu.memory_space<vmem>>, %arg7: memref<1x128xf32, #tpu.memory_space<vmem>>, %arg8: memref<512x128xbf16, #tpu.memory_space<vmem>>, %arg9: memref<1x128xf32, #tpu.memory_space<vmem>>, %arg10: memref<1x128xf32, #tpu.memory_space<vmem>>, %arg11: memref<384x128xbf16, #tpu.memory_space<vmem>>, %arg12: memref<1x128xf32, #tpu.memory_space<vmem>>, %arg13: memref<1x128xf32, #tpu.memory_space<vmem>>, %arg14: memref<384x128xbf16, #tpu.memory_space<vmem>>, %arg15: memref<1x128xf32, #tpu.memory_space<vmem>>, %arg16: memref<1x128xf32, #tpu.memory_space<vmem>>, %arg17: memref<128x128xbf16, #tpu.memory_space<vmem>>, %arg18: memref<1x128xf32, #tpu.memory_space<vmem>>, %arg19: memref<2x7x16xf32, #tpu.memory_space<vmem>>) attributes {dimension_semantics = [#tpu.dimension_semantics<arbitrary>], iteration_bounds = array<i64: 1>, scalar_prefetch = 0 : i64, scratch_operands = 0 : i64, tpu.core_type = #tpu.core_type<tc>, window_params = [{pipeline_mode = #tpu.pipeline_mode<synchronous>, transform_indices = @transform_0, window_bounds = array<i64: 2, 14, 16>}, {pipeline_mode = #tpu.pipeline_mode<synchronous>, transform_indices = @transform_1, window_bounds = array<i64: 16, 128>}, {pipeline_mode = #tpu.pipeline_mode<synchronous>, transform_indices = @transform_2, window_bounds = array<i64: 1, 128>}, {pipeline_mode = #tpu.pipeline_mode<synchronous>, transform_indices = @transform_3, window_bounds = array<i64: 1, 128>}, {pipeline_mode = #tpu.pipeline_mode<synchronous>, transform_indices = @transform_4, window_bounds = array<i64: 384, 128>}, {pipeline_mode = #tpu.pipeline_mode<synchronous>, transform_indices = @transform_5, window_bounds = array<i64: 1, 128>}, {pipeline_mode = #tpu.pipeline_mode<synchronous>, transform_indices = @transform_6, window_bounds = array<i64: 1, 128>}, {pipeline_mode = #tpu.pipeline_mode<synchronous>, transform_indices = @transform_7, window_bounds = array<i64: 512, 128>}, {pipeline_mode = #tpu.pipeline_mode<synchronous>, transform_indices = @transform_8, window_bounds = array<i64: 1, 128>}, {pipeline_mode = #tpu.pipeline_mode<synchronous>, transform_indices = @transform_9, window_bounds = array<i64: 1, 128>}, {pipeline_mode = #tpu.pipeline_mode<synchronous>, transform_indices = @transform_10, window_bounds = array<i64: 384, 128>}, {pipeline_mode = #tpu.pipeline_mode<synchronous>, transform_indices = @transform_11, window_bounds = array<i64: 1, 128>}, {pipeline_mode = #tpu.pipeline_mode<synchronous>, transform_indices = @transform_12, window_bounds = array<i64: 1, 128>}, {pipeline_mode = #tpu.pipeline_mode<synchronous>, transform_indices = @transform_13, window_bounds = array<i64: 384, 128>}, {pipeline_mode = #tpu.pipeline_mode<synchronous>, transform_indices = @transform_14, window_bounds = array<i64: 1, 128>}, {pipeline_mode = #tpu.pipeline_mode<synchronous>, transform_indices = @transform_15, window_bounds = array<i64: 1, 128>}, {pipeline_mode = #tpu.pipeline_mode<synchronous>, transform_indices = @transform_16, window_bounds = array<i64: 128, 128>}, {pipeline_mode = #tpu.pipeline_mode<synchronous>, transform_indices = @transform_17, window_bounds = array<i64: 1, 128>}, {pipeline_mode = #tpu.pipeline_mode<synchronous>, transform_indices = @transform_18, window_bounds = array<i64: 2, 7, 16>}]} {
    %c0 = arith.constant 0 : index
    %c0_0 = arith.constant 0 : index
    %c0_1 = arith.constant 0 : index
    %0 = vector.load %arg1[%c0, %c0_0, %c0_1] : memref<2x14x16xbf16, #tpu.memory_space<vmem>>, vector<2x14x16xbf16>
    %1 = vector.shape_cast %0 : vector<2x14x16xbf16> to vector<28x16xbf16>
    %c0_2 = arith.constant 0 : index
    %c0_3 = arith.constant 0 : index
    %2 = vector.load %arg2[%c0_2, %c0_3] : memref<16x128xbf16, #tpu.memory_space<vmem>>, vector<16x128xbf16>
    %cst = arith.constant dense<0.000000e+00> : vector<28x128xf32>
    %3 = tpu.matmul %1, %2, %cst {dimension_numbers = #tpu.dot_dimension_numbers<[1], [0], [0], [1], [0, 0, 1, 1], [], []>} : vector<28x16xbf16>, vector<16x128xbf16>, vector<28x128xf32> -> vector<28x128xf32>
    %c0_4 = arith.constant 0 : index
    %c0_5 = arith.constant 0 : index
    %4 = vector.load %arg3[%c0_4, %c0_5] : memref<1x128xf32, #tpu.memory_space<vmem>>, vector<1x128xf32>
    %c0_6 = arith.constant 0 : index
    %c0_7 = arith.constant 0 : index
    %5 = vector.load %arg4[%c0_6, %c0_7] : memref<1x128xf32, #tpu.memory_space<vmem>>, vector<1x128xf32>
    %cst_8 = arith.constant dense<0.000000e+00> : vector<128xf32>
    %6 = vector.multi_reduction <add>, %3, %cst_8 [0] : vector<28x128xf32> to vector<128xf32>
    %7 = vector.shape_cast %6 : vector<128xf32> to vector<1x128xf32>
    %cst_9 = arith.constant 0.0357142873 : f32
    %8 = vector.broadcast %cst_9 : f32 to vector<1x128xf32>
    %9 = arith.mulf %7, %8 : vector<1x128xf32>
    %10 = vector.broadcast %9 : vector<1x128xf32> to vector<28x128xf32>
    %11 = arith.subf %3, %10 : vector<28x128xf32>
    %12 = arith.mulf %11, %11 : vector<28x128xf32>
    %cst_10 = arith.constant dense<0.000000e+00> : vector<128xf32>
    %13 = vector.multi_reduction <add>, %12, %cst_10 [0] : vector<28x128xf32> to vector<128xf32>
    %14 = vector.shape_cast %13 : vector<128xf32> to vector<1x128xf32>
    %cst_11 = arith.constant 0.0357142873 : f32
    %15 = vector.broadcast %cst_11 : f32 to vector<1x128xf32>
    %16 = arith.mulf %14, %15 : vector<1x128xf32>
    %cst_12 = arith.constant 9.99999974E-6 : f32
    %17 = vector.broadcast %cst_12 : f32 to vector<1x128xf32>
    %18 = arith.addf %16, %17 : vector<1x128xf32>
    %19 = math.rsqrt %18 : vector<1x128xf32>
    %20 = arith.mulf %19, %4 : vector<1x128xf32>
    %21 = vector.broadcast %20 : vector<1x128xf32> to vector<28x128xf32>
    %22 = arith.mulf %11, %21 : vector<28x128xf32>
    %23 = vector.broadcast %5 : vector<1x128xf32> to vector<28x128xf32>
    %24 = arith.addf %22, %23 : vector<28x128xf32>
    %cst_13 = arith.constant 0.000000e+00 : f32
    %25 = vector.broadcast %cst_13 : f32 to vector<28x128xf32>
    %26 = arith.maximumf %24, %25 : vector<28x128xf32>
    %27 = vector.shape_cast %26 : vector<28x128xf32> to vector<2x14x128xf32>
    %c0_14 = arith.constant 0 : index
    %c0_15 = arith.constant 0 : index
    %28 = vector.load %arg5[%c0_14, %c0_15] : memref<384x128xbf16, #tpu.memory_space<vmem>>, vector<384x128xbf16>
    %c0_16 = arith.constant 0 : index
    %c0_17 = arith.constant 0 : index
    %29 = vector.load %arg6[%c0_16, %c0_17] : memref<1x128xf32, #tpu.memory_space<vmem>>, vector<1x128xf32>
    %c0_18 = arith.constant 0 : index
    %c0_19 = arith.constant 0 : index
    %30 = vector.load %arg7[%c0_18, %c0_19] : memref<1x128xf32, #tpu.memory_space<vmem>>, vector<1x128xf32>
    %cst_20 = arith.constant 0.000000e+00 : f32
    %31 = vector.broadcast %cst_20 : f32 to vector<2x1x128xf32>
    %32 = tpu.concatenate %31, %27, %31 in 1 : vector<2x1x128xf32>, vector<2x14x128xf32>, vector<2x1x128xf32> -> vector<2x16x128xf32>
    %33 = vector.extract_strided_slice %32 {offsets = [0, 0, 0], sizes = [2, 14, 128], strides = [1, 1, 1]} : vector<2x16x128xf32> to vector<2x14x128xf32>
    %34 = vector.extract_strided_slice %32 {offsets = [0, 1, 0], sizes = [2, 14, 128], strides = [1, 1, 1]} : vector<2x16x128xf32> to vector<2x14x128xf32>
    %35 = vector.extract_strided_slice %32 {offsets = [0, 2, 0], sizes = [2, 14, 128], strides = [1, 1, 1]} : vector<2x16x128xf32> to vector<2x14x128xf32>
    %36 = tpu.concatenate %33, %34, %35 in 2 : vector<2x14x128xf32>, vector<2x14x128xf32>, vector<2x14x128xf32> -> vector<2x14x384xf32>
    %37 = vector.shape_cast %36 : vector<2x14x384xf32> to vector<28x384xf32>
    %38 = arith.truncf %37 : vector<28x384xf32> to vector<28x384xbf16>
    %cst_21 = arith.constant dense<0.000000e+00> : vector<28x128xf32>
    %39 = tpu.matmul %38, %28, %cst_21 {dimension_numbers = #tpu.dot_dimension_numbers<[1], [0], [0], [1], [0, 0, 1, 1], [], []>} : vector<28x384xbf16>, vector<384x128xbf16>, vector<28x128xf32> -> vector<28x128xf32>
    %cst_22 = arith.constant dense<0.000000e+00> : vector<128xf32>
    %40 = vector.multi_reduction <add>, %39, %cst_22 [0] : vector<28x128xf32> to vector<128xf32>
    %41 = vector.shape_cast %40 : vector<128xf32> to vector<1x128xf32>
    %cst_23 = arith.constant 0.0357142873 : f32
    %42 = vector.broadcast %cst_23 : f32 to vector<1x128xf32>
    %43 = arith.mulf %41, %42 : vector<1x128xf32>
    %44 = vector.broadcast %43 : vector<1x128xf32> to vector<28x128xf32>
    %45 = arith.subf %39, %44 : vector<28x128xf32>
    %46 = arith.mulf %45, %45 : vector<28x128xf32>
    %cst_24 = arith.constant dense<0.000000e+00> : vector<128xf32>
    %47 = vector.multi_reduction <add>, %46, %cst_24 [0] : vector<28x128xf32> to vector<128xf32>
    %48 = vector.shape_cast %47 : vector<128xf32> to vector<1x128xf32>
    %cst_25 = arith.constant 0.0357142873 : f32
    %49 = vector.broadcast %cst_25 : f32 to vector<1x128xf32>
    %50 = arith.mulf %48, %49 : vector<1x128xf32>
    %cst_26 = arith.constant 9.99999974E-6 : f32
    %51 = vector.broadcast %cst_26 : f32 to vector<1x128xf32>
    %52 = arith.addf %50, %51 : vector<1x128xf32>
    %53 = math.rsqrt %52 : vector<1x128xf32>
    %54 = arith.mulf %53, %29 : vector<1x128xf32>
    %55 = vector.broadcast %54 : vector<1x128xf32> to vector<28x128xf32>
    %56 = arith.mulf %45, %55 : vector<28x128xf32>
    %57 = vector.broadcast %30 : vector<1x128xf32> to vector<28x128xf32>
    %58 = arith.addf %56, %57 : vector<28x128xf32>
    %cst_27 = arith.constant 0.000000e+00 : f32
    %59 = vector.broadcast %cst_27 : f32 to vector<28x128xf32>
    %60 = arith.maximumf %58, %59 : vector<28x128xf32>
    %61 = vector.shape_cast %60 : vector<28x128xf32> to vector<2x14x128xf32>
    %c0_28 = arith.constant 0 : index
    %c0_29 = arith.constant 0 : index
    %62 = vector.load %arg8[%c0_28, %c0_29] : memref<512x128xbf16, #tpu.memory_space<vmem>>, vector<512x128xbf16>
    %c0_30 = arith.constant 0 : index
    %c0_31 = arith.constant 0 : index
    %63 = vector.load %arg9[%c0_30, %c0_31] : memref<1x128xf32, #tpu.memory_space<vmem>>, vector<1x128xf32>
    %c0_32 = arith.constant 0 : index
    %c0_33 = arith.constant 0 : index
    %64 = vector.load %arg10[%c0_32, %c0_33] : memref<1x128xf32, #tpu.memory_space<vmem>>, vector<1x128xf32>
    %cst_34 = arith.constant 0.000000e+00 : f32
    %65 = vector.broadcast %cst_34 : f32 to vector<2x1x128xf32>
    %66 = tpu.concatenate %65, %61, %65 in 1 : vector<2x1x128xf32>, vector<2x14x128xf32>, vector<2x1x128xf32> -> vector<2x16x128xf32>
    %67 = vector.shape_cast %66 : vector<2x16x128xf32> to vector<2x8x2x128xf32>
    %68 = vector.extract_strided_slice %67 {offsets = [0, 0, 0, 0], sizes = [2, 7, 1, 128], strides = [1, 1, 1, 1]} : vector<2x8x2x128xf32> to vector<2x7x1x128xf32>
    %69 = vector.shape_cast %68 : vector<2x7x1x128xf32> to vector<2x7x128xf32>
    %70 = vector.extract_strided_slice %67 {offsets = [0, 0, 1, 0], sizes = [2, 7, 1, 128], strides = [1, 1, 1, 1]} : vector<2x8x2x128xf32> to vector<2x7x1x128xf32>
    %71 = vector.shape_cast %70 : vector<2x7x1x128xf32> to vector<2x7x128xf32>
    %72 = vector.extract_strided_slice %67 {offsets = [0, 1, 0, 0], sizes = [2, 7, 1, 128], strides = [1, 1, 1, 1]} : vector<2x8x2x128xf32> to vector<2x7x1x128xf32>
    %73 = vector.shape_cast %72 : vector<2x7x1x128xf32> to vector<2x7x128xf32>
    %74 = vector.extract_strided_slice %67 {offsets = [0, 1, 1, 0], sizes = [2, 7, 1, 128], strides = [1, 1, 1, 1]} : vector<2x8x2x128xf32> to vector<2x7x1x128xf32>
    %75 = vector.shape_cast %74 : vector<2x7x1x128xf32> to vector<2x7x128xf32>
    %76 = tpu.concatenate %69, %71, %73, %75 in 2 : vector<2x7x128xf32>, vector<2x7x128xf32>, vector<2x7x128xf32>, vector<2x7x128xf32> -> vector<2x7x512xf32>
    %77 = vector.shape_cast %76 : vector<2x7x512xf32> to vector<14x512xf32>
    %78 = arith.truncf %77 : vector<14x512xf32> to vector<14x512xbf16>
    %cst_35 = arith.constant dense<0.000000e+00> : vector<14x128xf32>
    %79 = tpu.matmul %78, %62, %cst_35 {dimension_numbers = #tpu.dot_dimension_numbers<[1], [0], [0], [1], [0, 0, 1, 1], [], []>} : vector<14x512xbf16>, vector<512x128xbf16>, vector<14x128xf32> -> vector<14x128xf32>
    %cst_36 = arith.constant dense<0.000000e+00> : vector<128xf32>
    %80 = vector.multi_reduction <add>, %79, %cst_36 [0] : vector<14x128xf32> to vector<128xf32>
    %81 = vector.shape_cast %80 : vector<128xf32> to vector<1x128xf32>
    %cst_37 = arith.constant 0.0714285746 : f32
    %82 = vector.broadcast %cst_37 : f32 to vector<1x128xf32>
    %83 = arith.mulf %81, %82 : vector<1x128xf32>
    %84 = vector.broadcast %83 : vector<1x128xf32> to vector<14x128xf32>
    %85 = arith.subf %79, %84 : vector<14x128xf32>
    %86 = arith.mulf %85, %85 : vector<14x128xf32>
    %cst_38 = arith.constant dense<0.000000e+00> : vector<128xf32>
    %87 = vector.multi_reduction <add>, %86, %cst_38 [0] : vector<14x128xf32> to vector<128xf32>
    %88 = vector.shape_cast %87 : vector<128xf32> to vector<1x128xf32>
    %cst_39 = arith.constant 0.0714285746 : f32
    %89 = vector.broadcast %cst_39 : f32 to vector<1x128xf32>
    %90 = arith.mulf %88, %89 : vector<1x128xf32>
    %cst_40 = arith.constant 9.99999974E-6 : f32
    %91 = vector.broadcast %cst_40 : f32 to vector<1x128xf32>
    %92 = arith.addf %90, %91 : vector<1x128xf32>
    %93 = math.rsqrt %92 : vector<1x128xf32>
    %94 = arith.mulf %93, %63 : vector<1x128xf32>
    %95 = vector.broadcast %94 : vector<1x128xf32> to vector<14x128xf32>
    %96 = arith.mulf %85, %95 : vector<14x128xf32>
    %97 = vector.broadcast %64 : vector<1x128xf32> to vector<14x128xf32>
    %98 = arith.addf %96, %97 : vector<14x128xf32>
    %cst_41 = arith.constant 0.000000e+00 : f32
    %99 = vector.broadcast %cst_41 : f32 to vector<14x128xf32>
    %100 = arith.maximumf %98, %99 : vector<14x128xf32>
    %101 = vector.shape_cast %100 : vector<14x128xf32> to vector<2x7x128xf32>
    %c0_42 = arith.constant 0 : index
    %c0_43 = arith.constant 0 : index
    %102 = vector.load %arg11[%c0_42, %c0_43] : memref<384x128xbf16, #tpu.memory_space<vmem>>, vector<384x128xbf16>
    %c0_44 = arith.constant 0 : index
    %c0_45 = arith.constant 0 : index
    %103 = vector.load %arg12[%c0_44, %c0_45] : memref<1x128xf32, #tpu.memory_space<vmem>>, vector<1x128xf32>
    %c0_46 = arith.constant 0 : index
    %c0_47 = arith.constant 0 : index
    %104 = vector.load %arg13[%c0_46, %c0_47] : memref<1x128xf32, #tpu.memory_space<vmem>>, vector<1x128xf32>
    %cst_48 = arith.constant 0.000000e+00 : f32
    %105 = vector.broadcast %cst_48 : f32 to vector<2x1x128xf32>
    %106 = tpu.concatenate %105, %101, %105 in 1 : vector<2x1x128xf32>, vector<2x7x128xf32>, vector<2x1x128xf32> -> vector<2x9x128xf32>
    %107 = vector.extract_strided_slice %106 {offsets = [0, 0, 0], sizes = [2, 7, 128], strides = [1, 1, 1]} : vector<2x9x128xf32> to vector<2x7x128xf32>
    %108 = vector.extract_strided_slice %106 {offsets = [0, 1, 0], sizes = [2, 7, 128], strides = [1, 1, 1]} : vector<2x9x128xf32> to vector<2x7x128xf32>
    %109 = vector.extract_strided_slice %106 {offsets = [0, 2, 0], sizes = [2, 7, 128], strides = [1, 1, 1]} : vector<2x9x128xf32> to vector<2x7x128xf32>
    %110 = tpu.concatenate %107, %108, %109 in 2 : vector<2x7x128xf32>, vector<2x7x128xf32>, vector<2x7x128xf32> -> vector<2x7x384xf32>
    %111 = vector.shape_cast %110 : vector<2x7x384xf32> to vector<14x384xf32>
    %112 = arith.truncf %111 : vector<14x384xf32> to vector<14x384xbf16>
    %cst_49 = arith.constant dense<0.000000e+00> : vector<14x128xf32>
    %113 = tpu.matmul %112, %102, %cst_49 {dimension_numbers = #tpu.dot_dimension_numbers<[1], [0], [0], [1], [0, 0, 1, 1], [], []>} : vector<14x384xbf16>, vector<384x128xbf16>, vector<14x128xf32> -> vector<14x128xf32>
    %cst_50 = arith.constant dense<0.000000e+00> : vector<128xf32>
    %114 = vector.multi_reduction <add>, %113, %cst_50 [0] : vector<14x128xf32> to vector<128xf32>
    %115 = vector.shape_cast %114 : vector<128xf32> to vector<1x128xf32>
    %cst_51 = arith.constant 0.0714285746 : f32
    %116 = vector.broadcast %cst_51 : f32 to vector<1x128xf32>
    %117 = arith.mulf %115, %116 : vector<1x128xf32>
    %118 = vector.broadcast %117 : vector<1x128xf32> to vector<14x128xf32>
    %119 = arith.subf %113, %118 : vector<14x128xf32>
    %120 = arith.mulf %119, %119 : vector<14x128xf32>
    %cst_52 = arith.constant dense<0.000000e+00> : vector<128xf32>
    %121 = vector.multi_reduction <add>, %120, %cst_52 [0] : vector<14x128xf32> to vector<128xf32>
    %122 = vector.shape_cast %121 : vector<128xf32> to vector<1x128xf32>
    %cst_53 = arith.constant 0.0714285746 : f32
    %123 = vector.broadcast %cst_53 : f32 to vector<1x128xf32>
    %124 = arith.mulf %122, %123 : vector<1x128xf32>
    %cst_54 = arith.constant 9.99999974E-6 : f32
    %125 = vector.broadcast %cst_54 : f32 to vector<1x128xf32>
    %126 = arith.addf %124, %125 : vector<1x128xf32>
    %127 = math.rsqrt %126 : vector<1x128xf32>
    %128 = arith.mulf %127, %103 : vector<1x128xf32>
    %129 = vector.broadcast %128 : vector<1x128xf32> to vector<14x128xf32>
    %130 = arith.mulf %119, %129 : vector<14x128xf32>
    %131 = vector.broadcast %104 : vector<1x128xf32> to vector<14x128xf32>
    %132 = arith.addf %130, %131 : vector<14x128xf32>
    %cst_55 = arith.constant 0.000000e+00 : f32
    %133 = vector.broadcast %cst_55 : f32 to vector<14x128xf32>
    %134 = arith.maximumf %132, %133 : vector<14x128xf32>
    %135 = vector.shape_cast %134 : vector<14x128xf32> to vector<2x7x128xf32>
    %c0_56 = arith.constant 0 : index
    %c0_57 = arith.constant 0 : index
    %136 = vector.load %arg14[%c0_56, %c0_57] : memref<384x128xbf16, #tpu.memory_space<vmem>>, vector<384x128xbf16>
    %c0_58 = arith.constant 0 : index
    %c0_59 = arith.constant 0 : index
    %137 = vector.load %arg15[%c0_58, %c0_59] : memref<1x128xf32, #tpu.memory_space<vmem>>, vector<1x128xf32>
    %c0_60 = arith.constant 0 : index
    %c0_61 = arith.constant 0 : index
    %138 = vector.load %arg16[%c0_60, %c0_61] : memref<1x128xf32, #tpu.memory_space<vmem>>, vector<1x128xf32>
    %cst_62 = arith.constant 0.000000e+00 : f32
    %139 = vector.broadcast %cst_62 : f32 to vector<2x1x128xf32>
    %140 = tpu.concatenate %139, %135, %139 in 1 : vector<2x1x128xf32>, vector<2x7x128xf32>, vector<2x1x128xf32> -> vector<2x9x128xf32>
    %141 = vector.extract_strided_slice %140 {offsets = [0, 0, 0], sizes = [2, 7, 128], strides = [1, 1, 1]} : vector<2x9x128xf32> to vector<2x7x128xf32>
    %142 = vector.extract_strided_slice %140 {offsets = [0, 1, 0], sizes = [2, 7, 128], strides = [1, 1, 1]} : vector<2x9x128xf32> to vector<2x7x128xf32>
    %143 = vector.extract_strided_slice %140 {offsets = [0, 2, 0], sizes = [2, 7, 128], strides = [1, 1, 1]} : vector<2x9x128xf32> to vector<2x7x128xf32>
    %144 = tpu.concatenate %141, %142, %143 in 2 : vector<2x7x128xf32>, vector<2x7x128xf32>, vector<2x7x128xf32> -> vector<2x7x384xf32>
    %145 = vector.shape_cast %144 : vector<2x7x384xf32> to vector<14x384xf32>
    %146 = arith.truncf %145 : vector<14x384xf32> to vector<14x384xbf16>
    %cst_63 = arith.constant dense<0.000000e+00> : vector<14x128xf32>
    %147 = tpu.matmul %146, %136, %cst_63 {dimension_numbers = #tpu.dot_dimension_numbers<[1], [0], [0], [1], [0, 0, 1, 1], [], []>} : vector<14x384xbf16>, vector<384x128xbf16>, vector<14x128xf32> -> vector<14x128xf32>
    %cst_64 = arith.constant dense<0.000000e+00> : vector<128xf32>
    %148 = vector.multi_reduction <add>, %147, %cst_64 [0] : vector<14x128xf32> to vector<128xf32>
    %149 = vector.shape_cast %148 : vector<128xf32> to vector<1x128xf32>
    %cst_65 = arith.constant 0.0714285746 : f32
    %150 = vector.broadcast %cst_65 : f32 to vector<1x128xf32>
    %151 = arith.mulf %149, %150 : vector<1x128xf32>
    %152 = vector.broadcast %151 : vector<1x128xf32> to vector<14x128xf32>
    %153 = arith.subf %147, %152 : vector<14x128xf32>
    %154 = arith.mulf %153, %153 : vector<14x128xf32>
    %cst_66 = arith.constant dense<0.000000e+00> : vector<128xf32>
    %155 = vector.multi_reduction <add>, %154, %cst_66 [0] : vector<14x128xf32> to vector<128xf32>
    %156 = vector.shape_cast %155 : vector<128xf32> to vector<1x128xf32>
    %cst_67 = arith.constant 0.0714285746 : f32
    %157 = vector.broadcast %cst_67 : f32 to vector<1x128xf32>
    %158 = arith.mulf %156, %157 : vector<1x128xf32>
    %cst_68 = arith.constant 9.99999974E-6 : f32
    %159 = vector.broadcast %cst_68 : f32 to vector<1x128xf32>
    %160 = arith.addf %158, %159 : vector<1x128xf32>
    %161 = math.rsqrt %160 : vector<1x128xf32>
    %162 = arith.mulf %161, %137 : vector<1x128xf32>
    %163 = vector.broadcast %162 : vector<1x128xf32> to vector<14x128xf32>
    %164 = arith.mulf %153, %163 : vector<14x128xf32>
    %165 = vector.broadcast %138 : vector<1x128xf32> to vector<14x128xf32>
    %166 = arith.addf %164, %165 : vector<14x128xf32>
    %cst_69 = arith.constant 0.000000e+00 : f32
    %167 = vector.broadcast %cst_69 : f32 to vector<14x128xf32>
    %168 = arith.maximumf %166, %167 : vector<14x128xf32>
    %169 = vector.shape_cast %168 : vector<14x128xf32> to vector<2x7x128xf32>
    %c0_70 = arith.constant 0 : index
    %c0_71 = arith.constant 0 : index
    %170 = vector.load %arg17[%c0_70, %c0_71] : memref<128x128xbf16, #tpu.memory_space<vmem>>, vector<128x128xbf16>
    %c0_72 = arith.constant 0 : index
    %c0_73 = arith.constant 0 : index
    %171 = vector.load %arg18[%c0_72, %c0_73] : memref<1x128xf32, #tpu.memory_space<vmem>>, vector<1x128xf32>
    %172 = vector.shape_cast %169 : vector<2x7x128xf32> to vector<14x128xf32>
    %173 = arith.truncf %172 : vector<14x128xf32> to vector<14x128xbf16>
    %cst_74 = arith.constant dense<0.000000e+00> : vector<14x128xf32>
    %174 = tpu.matmul %173, %170, %cst_74 {dimension_numbers = #tpu.dot_dimension_numbers<[1], [0], [0], [1], [0, 0, 1, 1], [], []>} : vector<14x128xbf16>, vector<128x128xbf16>, vector<14x128xf32> -> vector<14x128xf32>
    %175 = vector.broadcast %171 : vector<1x128xf32> to vector<14x128xf32>
    %176 = arith.addf %174, %175 : vector<14x128xf32>
    %177 = vector.extract_strided_slice %176 {offsets = [0, 0], sizes = [14, 16], strides = [1, 1]} : vector<14x128xf32> to vector<14x16xf32>
    %178 = vector.shape_cast %177 : vector<14x16xf32> to vector<2x7x16xf32>
    %c0_75 = arith.constant 0 : index
    %c0_76 = arith.constant 0 : index
    %c0_77 = arith.constant 0 : index
    %179 = vector.load %arg19[%c0_75, %c0_76, %c0_77] : memref<2x7x16xf32, #tpu.memory_space<vmem>>, vector<2x7x16xf32>
    tpu.vector_store %arg19[%c0_75, %c0_76, %c0_77], %178 {strides = array<i32>} : memref<2x7x16xf32, #tpu.memory_space<vmem>>, vector<2x7x16xf32>,
    return
  }
  func.func @transform_0(%arg0: i32) -> (i32, i32, i32) {
    %c0_i32 = arith.constant 0 : i32
    %c0_i32_0 = arith.constant 0 : i32
    %c0_i32_1 = arith.constant 0 : i32
    %c0_i32_2 = arith.constant 0 : i32
    return %c0_i32, %c0_i32_0, %c0_i32_1 : i32, i32, i32
  }
  func.func @transform_1(%arg0: i32) -> (i32, i32) {
    %c0_i32 = arith.constant 0 : i32
    %c0_i32_0 = arith.constant 0 : i32
    %c0_i32_1 = arith.constant 0 : i32
    return %c0_i32, %c0_i32_0 : i32, i32
  }
  func.func @transform_2(%arg0: i32) -> (i32, i32) {
    %c0_i32 = arith.constant 0 : i32
    %c0_i32_0 = arith.constant 0 : i32
    %c0_i32_1 = arith.constant 0 : i32
    return %c0_i32, %c0_i32_0 : i32, i32
  }
  func.func @transform_3(%arg0: i32) -> (i32, i32) {
    %c0_i32 = arith.constant 0 : i32
    %c0_i32_0 = arith.constant 0 : i32
    %c0_i32_1 = arith.constant 0 : i32
    return %c0_i32, %c0_i32_0 : i32, i32
  }
  func.func @transform_4(%arg0: i32) -> (i32, i32) {
    %c0_i32 = arith.constant 0 : i32
    %c0_i32_0 = arith.constant 0 : i32
    %c0_i32_1 = arith.constant 0 : i32
    return %c0_i32, %c0_i32_0 : i32, i32
  }
  func.func @transform_5(%arg0: i32) -> (i32, i32) {
    %c0_i32 = arith.constant 0 : i32
    %c0_i32_0 = arith.constant 0 : i32
    %c0_i32_1 = arith.constant 0 : i32
    return %c0_i32, %c0_i32_0 : i32, i32
  }
  func.func @transform_6(%arg0: i32) -> (i32, i32) {
    %c0_i32 = arith.constant 0 : i32
    %c0_i32_0 = arith.constant 0 : i32
    %c0_i32_1 = arith.constant 0 : i32
    return %c0_i32, %c0_i32_0 : i32, i32
  }
  func.func @transform_7(%arg0: i32) -> (i32, i32) {
    %c0_i32 = arith.constant 0 : i32
    %c0_i32_0 = arith.constant 0 : i32
    %c0_i32_1 = arith.constant 0 : i32
    return %c0_i32, %c0_i32_0 : i32, i32
  }
  func.func @transform_8(%arg0: i32) -> (i32, i32) {
    %c0_i32 = arith.constant 0 : i32
    %c0_i32_0 = arith.constant 0 : i32
    %c0_i32_1 = arith.constant 0 : i32
    return %c0_i32, %c0_i32_0 : i32, i32
  }
  func.func @transform_9(%arg0: i32) -> (i32, i32) {
    %c0_i32 = arith.constant 0 : i32
    %c0_i32_0 = arith.constant 0 : i32
    %c0_i32_1 = arith.constant 0 : i32
    return %c0_i32, %c0_i32_0 : i32, i32
  }
  func.func @transform_10(%arg0: i32) -> (i32, i32) {
    %c0_i32 = arith.constant 0 : i32
    %c0_i32_0 = arith.constant 0 : i32
    %c0_i32_1 = arith.constant 0 : i32
    return %c0_i32, %c0_i32_0 : i32, i32
  }
  func.func @transform_11(%arg0: i32) -> (i32, i32) {
    %c0_i32 = arith.constant 0 : i32
    %c0_i32_0 = arith.constant 0 : i32
    %c0_i32_1 = arith.constant 0 : i32
    return %c0_i32, %c0_i32_0 : i32, i32
  }
  func.func @transform_12(%arg0: i32) -> (i32, i32) {
    %c0_i32 = arith.constant 0 : i32
    %c0_i32_0 = arith.constant 0 : i32
    %c0_i32_1 = arith.constant 0 : i32
    return %c0_i32, %c0_i32_0 : i32, i32
  }
  func.func @transform_13(%arg0: i32) -> (i32, i32) {
    %c0_i32 = arith.constant 0 : i32
    %c0_i32_0 = arith.constant 0 : i32
    %c0_i32_1 = arith.constant 0 : i32
    return %c0_i32, %c0_i32_0 : i32, i32
  }
  func.func @transform_14(%arg0: i32) -> (i32, i32) {
    %c0_i32 = arith.constant 0 : i32
    %c0_i32_0 = arith.constant 0 : i32
    %c0_i32_1 = arith.constant 0 : i32
    return %c0_i32, %c0_i32_0 : i32, i32
  }
  func.func @transform_15(%arg0: i32) -> (i32, i32) {
    %c0_i32 = arith.constant 0 : i32
    %c0_i32_0 = arith.constant 0 : i32
    %c0_i32_1 = arith.constant 0 : i32
    return %c0_i32, %c0_i32_0 : i32, i32
  }
  func.func @transform_16(%arg0: i32) -> (i32, i32) {
    %c0_i32 = arith.constant 0 : i32
    %c0_i32_0 = arith.constant 0 : i32
    %c0_i32_1 = arith.constant 0 : i32
    return %c0_i32, %c0_i32_0 : i32, i32
  }
  func.func @transform_17(%arg0: i32) -> (i32, i32) {
    %c0_i32 = arith.constant 0 : i32
    %c0_i32_0 = arith.constant 0 : i32
    %c0_i32_1 = arith.constant 0 : i32
    return %c0_i32, %c0_i32_0 : i32, i32
  }
  func.func @transform_18(%arg0: i32) -> (i32, i32, i32) {
    %c0_i32 = arith.constant 0 : i32
    %c0_i32_0 = arith.constant 0 : i32
    %c0_i32_1 = arith.constant 0 : i32
    %c0_i32_2 = arith.constant 0 : i32
    return %c0_i32, %c0_i32_0, %c0_i32_1 : i32, i32, i32
  }
}

</mosaic_0001>

<bundles_post_ra>
// kernel: encoder_forward.1
= control target key start
LH: loop header
LB: loop body
LE: loop exit
PB: predicated region body
PF: predicated region fallthrough
CT: control target
= control target key end

     0   :  { %v79_v0 = vlaneseq  ;;  %v4622_v2 = vmov 1966171168   ;;  %vm259_vm0 = vcmask 130048   ;;  %vm319_vm1 = vcmask 1043456   ;;  %s5557_s1 = inlined_call_operand.vmem [shape: bf16[16,128], index: 1, kind: input, shape index: {}]   ;;  %s5558_s0 = inlined_call_operand.vmem [shape: bf16[2,14,16], index: 0, kind: input, shape index: {}]   ;;  %s5559_s4 = inlined_call_operand.vmem [shape: bf16[384,128], index: 4, kind: input, shape index: {}]   ;;  %s5560_s2 = inlined_call_operand.vmem [shape: f32[1,128], index: 2, kind: input, shape index: {}]   ;;  %s5561_s3 = inlined_call_operand.vmem [shape: f32[1,128], index: 3, kind: input, shape index: {}]   ;;  %s5562_s7 = inlined_call_operand.vmem [shape: bf16[512,128], index: 7, kind: input, shape index: {}]   ;;  %s5563_s5 = inlined_call_operand.vmem [shape: f32[1,128], index: 5, kind: input, shape index: {}]   ;;  %s5564_s6 = inlined_call_operand.vmem [shape: f32[1,128], index: 6, kind: input, shape index: {}]   ;;  %s5565_s10 = inlined_call_operand.vmem [shape: bf16[384,128], index: 10, kind: input, shape index: {}]   ;;  %s5566_s8 = inlined_call_operand.vmem [shape: f32[1,128], index: 8, kind: input, shape index: {}]   ;;  %s5567_s9 = inlined_call_operand.vmem [shape: f32[1,128], index: 9, kind: input, shape index: {}]   ;;  %s5568_s13 = inlined_call_operand.vmem [shape: bf16[384,128], index: 13, kind: input, shape index: {}]   ;;  %s5569_s11 = inlined_call_operand.vmem [shape: f32[1,128], index: 11, kind: input, shape index: {}]   ;;  %s5570_s12 = inlined_call_operand.vmem [shape: f32[1,128], index: 12, kind: input, shape index: {}]   ;;  %s5571_s16 = inlined_call_operand.vmem [shape: bf16[128,128], index: 16, kind: input, shape index: {}]   ;;  %s5572_s14 = inlined_call_operand.vmem [shape: f32[1,128], index: 14, kind: input, shape index: {}]   ;;  %s5573_s15 = inlined_call_operand.vmem [shape: f32[1,128], index: 15, kind: input, shape index: {}]   ;;  %s5574_s17 = inlined_call_operand.vmem [shape: f32[1,128], index: 17, kind: input, shape index: {}]   ;;  %s5575_s18 = inlined_call_operand.vmem [shape: f32[2,7,16], index: 18, kind: output, shape index: {}]  }
   0x1   :  { %5578 = sst [smem:[#allocation2_spill]] %s5557_s1  ;;  %v77_v3 = vunpack.c.l.s4 %v4622_v2  ;;  %vm552_vm2 = vcmask 1040384   ;;  %vm565_vm3 = vcmask 1046528   ;;  %vm578_vm4 = vcmask 1045504  }
   0x2   :  { %5579 = sst [smem:[#allocation3_spill]] %s5558_s0  ;;  %v4727_v5 = vshrl.u32 %v79_v0, 7  ;;  %vm1497_vm5 = vcmask 1041409   ;;  %vm1499_vm6 = vcmask 1042434   ;;  %vm1501_vm7 = vcmask 1043459  }
   0x3   :  { %5580 = sst [smem:[#allocation4_spill]] %s5559_s4  ;;  %v78_v8 = vunpack.c.0.s8 %v77_v3  ;;  %vm1503_vm8 = vcmask 1044484   ;;  %vm1505_vm9 = vcmask 1045509   ;;  %vm1507_vm10 = vcmask 1046534  }
   0x4   :  { %s5581_s29 = sld [smem:[#allocation2_spill]]  ;;  %vm4625_vm11 = vmmov 0   ;;  %vm4104_vm12 = vcmask 129024  }
   0x5   :  { %s5582_s19 = sld [smem:[#allocation3_spill]]  ;;  %v4736_v11 = vsub.s32 %v78_v8, %v4727_v5 }
   0x6   :  { %s5583_s26 = sld [smem:[#allocation4_spill]] }
   0xa   :  { %v4499_v1 = vld [vmem:[%s5581_s29] sm:$0xff]  }
   0xb   :  { %v4111_v4 = vld.sshfl [vmem:[%s5582_s19] sm:$0x33 pattern:$0x75316420]  ;;  %4409 = vmatprep.subr.bf16.mxu0 %v4499_v1 }
   0xc   :  { %v4112_v6 = vld.sshfl [vmem:[%s5582_s19 + $0x4] sm:$0x13 pattern:$0x75316420]  ;;  %v75_v7 = vcombine.high %v4111_v4, %v4111_v4  ;;  %4410 = vmatpush3.bf16.msra.mxu0 %v4499_v1  ;;  %v82_v15 = vrot.slane %v4111_v4, %v4736_v11  ;;  %v4500_v50 = vld [vmem:[%s5583_s26 + $0x78] sm:$0xff]   ;;  %v4503_v53 = vld [vmem:[%s5583_s26 + $0x70] sm:$0xff]  }
   0xd   :  { %v4113_v9 = vld.sshfl [vmem:[%s5582_s19 + $0x8] sm:$0x33 pattern:$0x75316420]  ;;  %v99_v10 = vcombine.high %v4112_v6, %v4112_v6  ;;  %v106_v17 = vrot.slane %v4112_v6, %v4736_v11  ;;  %v4501_v51 = vld [vmem:[%s5583_s26 + $0x38] sm:$0xff]   ;;  %4256 = vmatprep.subr.bf16.mxu1 %v4500_v50  ;;  %v4504_v54 = vld [vmem:[%s5583_s26 + $0x30] sm:$0xff]  }
   0xe   :  { %v122_v12 = vcombine.high %v4113_v9, %v4113_v9  ;;  %v4114_v13 = vld.sshfl [vmem:[%s5582_s19 + $0xc] sm:$0x13 pattern:$0x75316420]  ;;  %v89_v16 = vrot.slane %v75_v7, %v4736_v11  ;;  %v129_v19 = vrot.slane %v4113_v9, %v4736_v11  ;;  %v4502_v52 = vld [vmem:[%s5583_s26 + $0xb8] sm:$0xff]   ;;  %4257 = vmatpush3.bf16.msra.mxu1 %v4501_v51  ;;  %v4505_v55 = vld [vmem:[%s5583_s26 + $0xb0] sm:$0xff]  }
   0xf   :  { %v146_v14 = vcombine.high %v4114_v13, %v4114_v13  ;;  %v113_v18 = vrot.slane %v99_v10, %v4736_v11  ;;  %v153_v21 = vrot.slane %v4114_v13, %v4736_v11  ;;  %v114_v23 = vcombine.high %v106_v17, %v106_v17  ;;  %4415 = vmatprep.subr.bf16.mxu0 %v4502_v52  ;;  %v4506_v56 = vld [vmem:[%s5583_s26 + $0x68] sm:$0xff]   ;;  %v4509_v59 = vld [vmem:[%s5583_s26 + $0x60] sm:$0xff]   ;;  %v4512_v62 = vld [vmem:[%s5583_s26 + $0x58] sm:$0xff]  }
  0x10   :  { %v136_v20 = vrot.slane %v122_v12, %v4736_v11  ;;  %v164_v24 = vcombine.low %v82_v15, %v89_v16  ;;  %v4115_v25 = vcombine.high %v82_v15, %v89_v16  ;;  %v137_v27 = vcombine.high %v129_v19, %v129_v19  ;;  %4258 = vmatprep.subr.bf16.mxu1 %v4503_v53  ;;  %v4507_v57 = vld [vmem:[%s5583_s26 + $0x28] sm:$0xff]   ;;  %v4510_v60 = vld [vmem:[%s5583_s26 + $0x20] sm:$0xff]   ;;  %v4513_v63 = vld [vmem:[%s5583_s26 + $0x18] sm:$0xff]  }
  0x11   :  { %v160_v22 = vrot.slane %v146_v14, %v4736_v11  ;;  %v166_v26 = vcombine.low %v106_v17, %v113_v18  ;;  %v161_v29 = vcombine.high %v153_v21, %v153_v21  ;;  %v167_v30 = vcombine.low %v114_v23, %v129_v19  ;;  %v4508_v58 = vld [vmem:[%s5583_s26 + $0xa8] sm:$0xff]   ;;  %v4511_v61 = vld [vmem:[%s5583_s26 + $0xa0] sm:$0xff]   ;;  %v4514_v0 = vld [vmem:[%s5583_s26 + $0x98] sm:$0xff]  }
  0x12   :  { %v138_v28 = vcombine.high %v136_v20, %v136_v20  ;;  %v174_v31 = vrot.slane %v164_v24, %v4736_v11  ;;  %v181_v32 = vrot.slane %v4115_v25, %v4736_v11  ;;  %v213_v34 = vcombine.low %v136_v20, %v137_v27  ;;  %4259 = vmatpush3.bf16.msra.mxu1 %v4504_v54  ;;  %v4515_v1 = vld [vmem:[%s5583_s26 + $0x50] sm:$0xff]   ;;  %v4518_v4 = vld [vmem:[%s5583_s26 + $0x48] sm:$0xff]   ;;  %v4521_v8 = vld [vmem:[%s5583_s26 + $0x40] sm:$0xff]  }
  0x13   :  { %v188_v33 = vrot.slane %v166_v26, %v4736_v11  ;;  %v215_v36 = vcombine.low %v160_v22, %v161_v29  ;;  %v195_v37 = vrot.slane %v167_v30, %v4736_v11  ;;  %4260 = vmatprep.subr.bf16.mxu1 %v4506_v56  ;;  %v4517_v2 = vld [vmem:[%s5583_s26 + $0x90] sm:$0xff]   ;;  %v4520_v6 = vld [vmem:[%s5583_s26 + $0x88] sm:$0xff]   ;;  %v4523_v9 = vld [vmem:[%s5583_s26 + $0x80] sm:$0xff]   ;;  %v4838_v50 = vsub.s32 0, %v4727_v5 }
  0x14   :  { %v214_v35 = vcombine.low %v138_v28, %v153_v21  ;;  %v196_v38 = vcombine.low %v174_v31, %v181_v32  ;;  %v222_v39 = vrot.slane %v213_v34, %v4736_v11  ;;  %v4516_v3 = vld [vmem:[%s5583_s26 + $0x10] sm:$0xff]   ;;  %v4519_v7 = vld [vmem:[%s5583_s26 + $0x8] sm:$0xff]   ;;  %v4522_v10 = vld [vmem:[%s5583_s26] sm:$0xff]  }
  0x15   :  { %v236_v41 = vrot.slane %v215_v36, %v4736_v11  ;;  %v197_v42 = vcombine.low %v188_v33, %v195_v37 }
  0x16   :  { %v229_v40 = vrot.slane %v214_v35, %v4736_v11  ;;  %v204_v43 = vrot.slane %v196_v38, %v4736_v11  ;;  %4261 = vmatpush3.bf16.msra.mxu1 %v4507_v57 }
  0x17   :  { %v251_v45 = vrot.slane %v236_v41, %v4736_v11  ;;  %v211_v46 = vrot.slane %v197_v42, %v4736_v11  ;;  %4262 = vmatprep.subr.bf16.mxu1 %v4509_v59 }
  0x18   :  { %v237_v44 = vcombine.low %v222_v39, %v229_v40 }
  0x19   :  { %v212_v48 = vcombine.low %v204_v43, %v211_v46 }
  0x1a   :  { %v244_v47 = vrot.slane %v237_v44, %v4736_v11  ;;  %4263 = vmatpush3.bf16.msra.mxu1 %v4510_v60 }
  0x1b   :  { %4411 = vmatprep.mubr.msk.bf16.mxu0 %vm259_vm0, %v212_v48  ;;  %4264 = vmatprep.subr.bf16.mxu1 %v4512_v62  ;;  %v4623_v48 = vmov 1983009808  }
  0x1c   :  { %v252_v49 = vcombine.low %v244_v47, %v251_v45  ;;  %v315_v47 = vld [vmem:[%s5560_s2] sm:$0x1] }
  0x1e   :  { %4412 = vmatmul.mubr.msk.bf16.vlgmr.msra.gmra.mxu0 %vm259_vm0, %v252_v49  ;;  %4265 = vmatpush3.bf16.msra.mxu1 %v4513_v63  ;;  %v379_v49 = vunpack.c.l.s4 %v4623_v48 }
  0x1f   :  { %4416 = vmatpush3.bf16.msra.mxu0 %v4502_v52  ;;  %4266 = vmatprep.subr.bf16.mxu1 %v4515_v1 }
  0x20   :  { %4417 = vmatprep.subr.bf16.mxu0 %v4505_v55  ;;  %v380_v53 = vunpack.c.0.s8 %v379_v49 }
  0x22   :  { %4267 = vmatpush3.bf16.msra.mxu1 %v4516_v3  ;;  %v4845_v60 = vsub.s32 %v380_v53, %v4727_v5 }
  0x23   :  { %4418 = vmatpush3.bf16.msra.mxu0 %v4505_v55  ;;  %4268 = vmatprep.subr.bf16.mxu1 %v4518_v4  ;;  %v4119_v55 = vld [vmem:[%s5561_s3] ss:$0 sm:$0xff] }
  0x24   :  { %4419 = vmatprep.subr.bf16.mxu0 %v4508_v58 }
  0x26   :  { %4269 = vmatpush3.bf16.msra.mxu1 %v4519_v7 }
  0x27   :  { %4420 = vmatpush3.bf16.msra.mxu0 %v4508_v58  ;;  %4270 = vmatprep.subr.bf16.mxu1 %v4521_v8 }
  0x28   :  { %4421 = vmatprep.subr.bf16.mxu0 %v4511_v61 }
  0x2a   :  { %4271 = vmatpush3.bf16.msra.mxu1 %v4522_v10 }
  0x2b   :  { %4422 = vmatpush3.bf16.msra.mxu0 %v4511_v61 }
  0x2c   :  { %4423 = vmatprep.subr.bf16.mxu0 %v4514_v0 }
  0x2f   :  { %4424 = vmatpush3.bf16.msra.mxu0 %v4514_v0 }
  0x30   :  { %4425 = vmatprep.subr.bf16.mxu0 %v4517_v2 }
  0x33   :  { %4426 = vmatpush3.bf16.msra.mxu0 %v4517_v2 }
  0x34   :  { %4427 = vmatprep.subr.bf16.mxu0 %v4520_v6 }
  0x37   :  { %4428 = vmatpush3.bf16.msra.mxu0 %v4520_v6 }
  0x38   :  { %4429 = vmatprep.subr.bf16.mxu0 %v4523_v9 }
  0x3b   :  { %4430 = vmatpush3.bf16.msra.mxu0 %v4523_v9 }
  0xde   :  { %v4413_v12 = vpop.f32.mrf.mxu0 }
  0xe0   :  { %v300_v13 = vpop.f32.mrf.mxu0 }
  0xe2   :  { %v4414_v14 = vpop.f32.mrf.mxu0 }
  0xe3   :  { %v320_v18 = vsel %vm319_vm1, %v4414_v14, 0.0 }
  0xe4   :  { %v303_v15 = vpop.f32.mrf.mxu0 }
  0xe5   :  { %v317_v16 = vadd.f32 %v303_v15, %v300_v13 }
  0xe7   :  { %v318_v17 = vadd.f32 %v4413_v12, %v317_v16 }
  0xe9   :  { %v321_v19 = vadd.f32 %v320_v18, %v318_v17 }
  0xeb   :  { %v322_v20 = vrot.slane %v321_v19, 4 }
  0xed   :  { %v323_v21 = vadd.f32 %v322_v20, %v321_v19 }
  0xef   :  { %v324_v22 = vrot.slane %v323_v21, 2 }
  0xf1   :  { %v325_v23 = vadd.f32 %v324_v22, %v323_v21 }
  0xf3   :  { %v326_v24 = vrot.slane %v325_v23, 1 }
  0xf5   :  { %v327_v25 = vadd.f32 %v326_v24, %v325_v23 }
  0xf7   :  { %v328_v26 = vmul.f32 0.035714287, %v327_v25 }
  0xf9   :  { %v329_v27 = vsub.f32 %v300_v13, %v328_v26  ;;  %v330_v28 = vsub.f32 %v303_v15, %v328_v26  ;;  %v331_v29 = vsub.f32 %v4413_v12, %v328_v26  ;;  %v332_v30 = vsub.f32 %v4414_v14, %v328_v26 }
  0xfb   :  { %v333_v31 = vmul.f32 %v329_v27, %v329_v27  ;;  %v334_v32 = vmul.f32 %v330_v28, %v330_v28  ;;  %v336_v33 = vmul.f32 %v332_v30, %v332_v30  ;;  %v335_v34 = vmul.f32 %v331_v29, %v331_v29 }
  0xfd   :  { %v337_v35 = vadd.f32 %v334_v32, %v333_v31  ;;  %v339_v37 = vsel %vm319_vm1, %v336_v33, 0.0 }
  0xff   :  { %v338_v36 = vadd.f32 %v337_v35, %v335_v34 }
 0x101   :  { %v340_v38 = vadd.f32 %v339_v37, %v338_v36 }
 0x103   :  { %v341_v39 = vrot.slane %v340_v38, 4 }
 0x105   :  { %v342_v40 = vadd.f32 %v341_v39, %v340_v38 }
 0x107   :  { %v343_v41 = vrot.slane %v342_v40, 2 }
 0x109   :  { %v344_v42 = vadd.f32 %v343_v41, %v342_v40 }
 0x10b   :  { %v345_v43 = vrot.slane %v344_v42, 1 }
 0x10d   :  { %v346_v44 = vadd.f32 %v345_v43, %v344_v42 }
 0x10f   :  { %v347_v45 = vmul.f32 0.035714287, %v346_v44 }
 0x111   :  { %v348_v46 = vadd.f32 1e-05, %v347_v45 }
 0x113   :  { %4612 = vrsqrt.f32 %v348_v46 }
 0x120   :  { %v4613_v51 = vpop.eup %4612 }
 0x121   :  { %v350_v52 = vmul.f32 %v4613_v51, %v315_v47 }
 0x123   :  { %v354_v54 = vrot.slane %v350_v52, %v4838_v50 }
 0x125   :  { %v355_v56 = vmul.f32 %v354_v54, %v329_v27  ;;  %v356_v57 = vmul.f32 %v354_v54, %v330_v28  ;;  %v357_v58 = vmul.f32 %v354_v54, %v331_v29  ;;  %v358_v59 = vmul.f32 %v354_v54, %v332_v30 }
 0x127   :  { %v365_v61 = vadd.f32 %v4119_v55, %v355_v56  ;;  %v366_v62 = vadd.f32 %v4119_v55, %v356_v57  ;;  %v367_v63 = vadd.f32 %v4119_v55, %v357_v58  ;;  %v368_v0 = vadd.f32 %v4119_v55, %v358_v59 }
 0x129   :  { %v369_v1 = vmax.f32 %v365_v61, 0.0  ;;  %v370_v2 = vmax.f32 %v366_v62, 0.0  ;;  %v371_v3 = vmax.f32 %v367_v63, 0.0  ;;  %v372_v4 = vmax.f32 %v368_v0, 0.0 }
 0x12b   :  { %v377_v6 = vcombine.high %v369_v1, %v369_v1  ;;  %v384_v7 = vrot.slane %v369_v1, %v4845_v60  ;;  %v394_v8 = vcombine.high %v370_v2, %v370_v2  ;;  %v401_v9 = vrot.slane %v370_v2, %v4845_v60 }
 0x12c   :  { %v411_v10 = vcombine.high %v371_v3, %v371_v3  ;;  %v418_v12 = vrot.slane %v371_v3, %v4845_v60  ;;  %v434_v13 = vrot.slane %v372_v4, %v4845_v60 }
 0x12d   :  { %v391_v14 = vrot.slane %v377_v6, %v4845_v60  ;;  %v392_v15 = vcombine.high %v384_v7, %v384_v7  ;;  %v408_v16 = vrot.slane %v394_v8, %v4845_v60  ;;  %v409_v17 = vcombine.high %v401_v9, %v401_v9 }
 0x12e   :  { %v425_v18 = vrot.slane %v411_v10, %v4845_v60  ;;  %v426_v19 = vcombine.high %v418_v12, %v418_v12  ;;  %v435_v25 = vcombine.high %v434_v13, %v434_v13 }
 0x12f   :  { %v393_v20 = vcombine.high %v391_v14, %v391_v14  ;;  %v410_v21 = vcombine.high %v408_v16, %v408_v16  ;;  %v486_v22 = vcombine.low %v384_v7, %v392_v15  ;;  %v503_v23 = vcombine.low %v401_v9, %v409_v17 }
 0x130   :  { %v427_v24 = vcombine.high %v425_v18, %v425_v18  ;;  %v520_v26 = vcombine.low %v426_v19, %v425_v18  ;;  %v517_v29 = vrot.slane %v408_v16, %v4845_v60  ;;  %v550_v38 = vrot.slane %v435_v25, %v4845_v60 }
 0x131   :  { %v487_v27 = vcombine.low %v391_v14, %v393_v20  ;;  %v510_v28 = vrot.slane %v503_v23, %v4845_v60  ;;  %v519_v30 = vcombine.low %v410_v21, %v418_v12  ;;  %v494_v31 = vrot.slane %v486_v22, %v4845_v60 }
 0x132   :  { %v536_v32 = vcombine.low %v427_v24, %v434_v13  ;;  %v534_v36 = vrot.slane %v520_v26, %v4845_v60 }
 0x133   :  { %v501_v33 = vrot.slane %v487_v27, %v4845_v60  ;;  %v518_v34 = vcombine.low %v510_v28, %v517_v29  ;;  %v527_v35 = vrot.slane %v519_v30, %v4845_v60 }
 0x134   :  { %v543_v37 = vrot.slane %v536_v32, %v4845_v60 }
 0x135   :  { %v502_v39 = vcombine.low %v494_v31, %v501_v33  ;;  %v535_v40 = vcombine.low %v527_v35, %v534_v36  ;;  %v554_v43 = vrot.slane %v518_v34, 7 }
 0x136   :  { %v551_v41 = vcombine.low %v543_v37, %v550_v38 }
 0x137   :  { %v553_v42 = vrot.slane %v502_v39, 7  ;;  %v556_v44 = vrot.slane %v535_v40, 7 }
 0x138   :  { %v557_v45 = vrot.slane %v551_v41, 7 }
 0x139   :  { %v555_v46 = vsel %vm552_vm2, %v553_v42, %v554_v43  ;;  %v564_v47 = vsel %vm552_vm2, 0.0, %v556_v44  ;;  %v563_v48 = vsel %vm552_vm2, 0.0, %v553_v42 }
 0x13a   :  { %v558_v49 = vsel %vm552_vm2, %v556_v44, %v557_v45  ;;  %v566_v51 = vsel %vm565_vm3, %v555_v46, 0.0  ;;  %v579_v52 = vrot.slane %v563_v48, 2  ;;  %v582_v53 = vrot.slane %v564_v47, 2 }
 0x13b   :  { %v567_v54 = vsel %vm565_vm3, %v558_v49, 0.0  ;;  %v580_v55 = vrot.slane %v566_v51, 2  ;;  %v572_v56 = vrot.slane %v563_v48, 1  ;;  %v573_v57 = vrot.slane %v566_v51, 1 }
 0x13c   :  { %v4868_v58 = vrot.slane %v567_v54, 2  ;;  %v575_v59 = vrot.slane %v564_v47, 1  ;;  %v576_v61 = vrot.slane %v567_v54, 1 }
 0x13d   :  { %v581_v62 = vsel %vm578_vm4, %v579_v52, %v580_v55  ;;  %v622_v63 = vcombine.high %v580_v55, %v580_v55  ;;  %v643_v0 = vrot.slane %v580_v55, %v4845_v60  ;;  %v574_v1 = vsel %vm565_vm3, %v572_v56, %v573_v57 }
 0x13e   :  { %v584_v2 = vsel %vm578_vm4, %v582_v53, %v4868_v58  ;;  %v587_v3 = vcombine.high %v581_v62, %v581_v62  ;;  %v608_v4 = vrot.slane %v581_v62, %v4845_v60  ;;  %v577_v6 = vsel %vm565_vm3, %v575_v59, %v576_v61 }
 0x13f   :  { %v650_v7 = vrot.slane %v622_v63, %v4845_v60  ;;  %v656_v8 = vcombine.high %v584_v2, %v584_v2  ;;  %v677_v9 = vrot.slane %v584_v2, %v4845_v60  ;;  %v775_v10 = vrot.slane %v643_v0, %v4845_v60 }
 0x140   :  { %v615_v12 = vrot.slane %v587_v3, %v4845_v60  ;;  %v740_v13 = vrot.slane %v608_v4, %v4845_v60  ;;  %v585_v14 = vcombine.low %v563_v48, %v574_v1  ;;  %v586_v15 = vcombine.high %v563_v48, %v574_v1 }
 0x141   :  { %v4121_v16 = vcombine.low %v650_v7, %v677_v9  ;;  %v620_v17 = vcombine.low %v566_v51, %v573_v57  ;;  %v621_v18 = vcombine.high %v566_v51, %v573_v57  ;;  %v654_v19 = vcombine.low %v564_v47, %v577_v6 }
 0x142   :  { %v754_v20 = vrot.slane %v615_v12, %v4845_v60  ;;  %v594_v21 = vrot.slane %v585_v14, %v4845_v60  ;;  %v601_v22 = vrot.slane %v586_v15, %v4845_v60  ;;  %v655_v23 = vcombine.high %v564_v47, %v577_v6 }
 0x143   :  { %v789_v24 = vrot.slane %v4121_v16, %v4845_v60  ;;  %v629_v25 = vrot.slane %v620_v17, %v4845_v60  ;;  %v636_v26 = vrot.slane %v621_v18, %v4845_v60  ;;  %v663_v27 = vrot.slane %v654_v19, %v4845_v60  ;;  %v4524_v16 = vld [vmem:[%s5562_s7 + $0x78] sm:$0xff]  }
 0x144   :  { %v757_v28 = vcombine.low %v740_v13, %v754_v20  ;;  %v670_v29 = vrot.slane %v655_v23, %v4845_v60  ;;  %v733_v30 = vrot.slane %v594_v21, %v4845_v60  ;;  %v747_v31 = vrot.slane %v601_v22, %v4845_v60  ;;  %v4525_v17 = vld [vmem:[%s5562_s7 + $0xf8] sm:$0xff]   ;;  %4294 = vmatprep.subr.bf16.mxu1 %v4524_v16  ;;  %v4528_v20 = vld [vmem:[%s5562_s7 + $0x70] sm:$0xff]  }
 0x145   :  { %v792_v32 = vcombine.low %v775_v10, %v789_v24  ;;  %v686_v33 = vcombine.high %v663_v27, %v677_v9  ;;  %v4120_v34 = vcombine.low %v636_v26, %v663_v27  ;;  %v768_v35 = vrot.slane %v629_v25, %v4845_v60  ;;  %v4526_v18 = vld [vmem:[%s5562_s7 + $0x38] sm:$0xff]   ;;  %4316 = vmatprep.subr.bf16.mxu0 %v4525_v17  ;;  %v4529_v21 = vld [vmem:[%s5562_s7 + $0xf0] sm:$0xff]   ;;  %v4532_v24 = vld [vmem:[%s5562_s7 + $0x68] sm:$0xff]  }
 0x146   :  { %v756_v36 = vcombine.high %v733_v30, %v747_v31  ;;  %v755_v37 = vcombine.low %v733_v30, %v747_v31  ;;  %v684_v38 = vrot.slane %v656_v8, %v4845_v60  ;;  %v689_v39 = vcombine.low %v567_v54, %v576_v61  ;;  %v4527_v19 = vld [vmem:[%s5562_s7 + $0xb8] sm:$0xff]   ;;  %v4530_v22 = vld [vmem:[%s5562_s7 + $0x30] sm:$0xff]   ;;  %v4533_v25 = vld [vmem:[%s5562_s7 + $0xe8] sm:$0xff]  }
 0x147   :  { %v859_v40 = vpack.c.bf16 %v792_v32, %v757_v28  ;;  %v782_v41 = vrot.slane %v4120_v34, %v4845_v60  ;;  %v690_v42 = vcombine.high %v567_v54, %v576_v61  ;;  %v712_v43 = vrot.slane %v4868_v58, %v4845_v60  ;;  %v4531_v23 = vld [vmem:[%s5562_s7 + $0xb0] sm:$0xff]   ;;  %v4534_v26 = vld [vmem:[%s5562_s7 + $0x28] sm:$0xff]   ;;  %v4536_v28 = vld [vmem:[%s5562_s7 + $0x60] sm:$0xff]  }
 0x148   :  { %v688_v44 = vcombine.high %v670_v29, %v684_v38  ;;  %v698_v45 = vrot.slane %v689_v39, %v4845_v60  ;;  %v4122_v46 = vcombine.low %v686_v33, %v670_v29  ;;  %v687_v47 = vcombine.low %v670_v29, %v684_v38  ;;  %v4535_v27 = vld [vmem:[%s5562_s7 + $0xa8] sm:$0xff]   ;;  %v4537_v29 = vld [vmem:[%s5562_s7 + $0xe0] sm:$0xff]   ;;  %v4540_v32 = vld [vmem:[%s5562_s7 + $0x58] sm:$0xff]  }
 0x149   :  { %4431 = vmatprep.mubr.bf16.mxu0 %v859_v40  ;;  %v791_v48 = vcombine.high %v768_v35, %v782_v41  ;;  %v790_v49 = vcombine.low %v768_v35, %v782_v41  ;;  %v705_v51 = vrot.slane %v690_v42, %v4845_v60  ;;  %v691_v52 = vcombine.high %v4868_v58, %v4868_v58  ;;  %v4538_v30 = vld [vmem:[%s5562_s7 + $0x20] sm:$0xff]   ;;  %v4541_v33 = vld [vmem:[%s5562_s7 + $0xd8] sm:$0xff]   ;;  %v4545_v39 = vld [vmem:[%s5562_s7 + $0xd0] sm:$0xff]  }
 0x14a   :  { %v721_v53 = vcombine.high %v698_v45, %v712_v43  ;;  %v4124_v55 = vcombine.low %v688_v44, %v698_v45  ;;  %v803_v54 = vrot.slane %v4122_v46, %v4845_v60  ;;  %v720_v56 = vcombine.low %v698_v45, %v712_v43  ;;  %v4539_v31 = vld [vmem:[%s5562_s7 + $0xa0] sm:$0xff]   ;;  %v4542_v35 = vld [vmem:[%s5562_s7 + $0x18] sm:$0xff]   ;;  %v4546_v41 = vld [vmem:[%s5562_s7 + $0x10] sm:$0xff]  }
 0x14b   :  { %v858_v57 = vpack.c.bf16 %v791_v48, %v756_v36  ;;  %v857_v59 = vpack.c.bf16 %v790_v49, %v755_v37  ;;  %v719_v61 = vrot.slane %v691_v52, %v4845_v60  ;;  %v4123_v62 = vcombine.high %v677_v9, %v687_v47  ;;  %v4543_v36 = vld [vmem:[%s5562_s7 + $0x98] sm:$0xff]   ;;  %v4547_v42 = vld [vmem:[%s5562_s7 + $0x90] sm:$0xff]   ;;  %v4548_v44 = vld [vmem:[%s5562_s7 + $0x48] sm:$0xff]  }
 0x14c   :  { %v817_v63 = vrot.slane %v4124_v55, %v4845_v60  ;;  %v4126_v0 = vcombine.low %v721_v53, %v705_v51  ;;  %v4125_v1 = vcombine.high %v684_v38, %v720_v56  ;;  %v4544_v38 = vld [vmem:[%s5562_s7 + $0x50] sm:$0xff]   ;;  %v4549_v46 = vld [vmem:[%s5562_s7 + $0xc8] sm:$0xff]  }
 0x14d   :  { %1039 = vmatprep.mubr.bf16.mxu1 %v858_v57  ;;  %v722_v2 = vcombine.low %v705_v51, %v719_v61  ;;  %v810_v3 = vrot.slane %v4123_v62, %v4845_v60  ;;  %v4550_v48 = vld [vmem:[%s5562_s7 + $0x8] sm:$0xff]   ;;  %v4554_v62 = vld [vmem:[%s5562_s7] sm:$0xff]  }
 0x14e   :  { %1040 = vmatmul.mubr.bf16.vlgmr.msra.gmra.mxu1 %v857_v59  ;;  %v826_v58 = vcombine.high %v803_v54, %v817_v63  ;;  %v836_v4 = vrot.slane %v4126_v0, %v4845_v60  ;;  %v824_v6 = vrot.slane %v4125_v1, %v4845_v60  ;;  %v825_v12 = vcombine.low %v803_v54, %v817_v63  ;;  %v4551_v51 = vld [vmem:[%s5562_s7 + $0x88] sm:$0xff]   ;;  %v4552_v54 = vld [vmem:[%s5562_s7 + $0x40] sm:$0xff]  }
 0x14f   :  { %v4127_v7 = vcombine.high %v712_v43, %v722_v2  ;;  %4295 = vmatpush3.bf16.msra.mxu1 %v4526_v18  ;;  %v4553_v59 = vld [vmem:[%s5562_s7 + $0xc0] sm:$0xff]  }
 0x150   :  { %v844_v8 = vcombine.high %v836_v4, %v836_v4  ;;  %v827_v10 = vcombine.low %v810_v3, %v824_v6  ;;  %v860_v15 = vpack.c.bf16 %v836_v4, %v825_v12  ;;  %4296 = vmatprep.subr.bf16.mxu1 %v4528_v20  ;;  %v4555_v0 = vld [vmem:[%s5562_s7 + $0x80] sm:$0xff]  }
 0x151   :  { %v843_v9 = vrot.slane %v4127_v7, %v4845_v60 }
 0x152   :  { %v861_v13 = vpack.c.bf16 %v844_v8, %v826_v58 }
 0x153   :  { %v862_v14 = vpack.c.bf16 %v843_v9, %v827_v10  ;;  %4297 = vmatpush3.bf16.msra.mxu1 %v4530_v22 }
 0x154   :  { %1047 = vmatprep.mubr.bf16.mxu1 %v861_v13  ;;  %4298 = vmatprep.subr.bf16.mxu1 %v4532_v24 }
 0x155   :  { %4432 = vmatmul.mubr.bf16.vlgmr.msra.gmra.mxu0 %v862_v14 }
 0x156   :  { %1048 = vmatmul.mubr.bf16.gmra.mxu1 %v860_v15  ;;  %4317 = vmatpush3.bf16.msra.mxu0 %v4527_v19 }
 0x157   :  { %4318 = vmatprep.subr.bf16.mxu0 %v4529_v21  ;;  %4299 = vmatpush3.bf16.msra.mxu1 %v4534_v26 }
 0x158   :  { %4300 = vmatprep.subr.bf16.mxu1 %v4536_v28 }
 0x15a   :  { %4319 = vmatpush3.bf16.msra.mxu0 %v4531_v23 }
 0x15b   :  { %4320 = vmatprep.subr.bf16.mxu0 %v4533_v25  ;;  %4301 = vmatpush3.bf16.msra.mxu1 %v4538_v30 }
 0x15c   :  { %4302 = vmatprep.subr.bf16.mxu1 %v4540_v32 }
 0x15e   :  { %4321 = vmatpush3.bf16.msra.mxu0 %v4535_v27 }
 0x15f   :  { %4322 = vmatprep.subr.bf16.mxu0 %v4537_v29  ;;  %4303 = vmatpush3.bf16.msra.mxu1 %v4542_v35 }
 0x160   :  { %4304 = vmatprep.subr.bf16.mxu1 %v4544_v38 }
 0x162   :  { %4323 = vmatpush3.bf16.msra.mxu0 %v4539_v31 }
 0x163   :  { %4324 = vmatprep.subr.bf16.mxu0 %v4541_v33  ;;  %4305 = vmatpush3.bf16.msra.mxu1 %v4546_v41 }
 0x164   :  { %4306 = vmatprep.subr.bf16.mxu1 %v4548_v44 }
 0x166   :  { %4325 = vmatpush3.bf16.msra.mxu0 %v4543_v36 }
 0x167   :  { %4326 = vmatprep.subr.bf16.mxu0 %v4545_v39  ;;  %4307 = vmatpush3.bf16.msra.mxu1 %v4550_v48  ;;  %v484_v39 = vld [vmem:[%s5563_s5] sm:$0x1] }
 0x168   :  { %4308 = vmatprep.subr.bf16.mxu1 %v4552_v54 }
 0x16a   :  { %4327 = vmatpush3.bf16.msra.mxu0 %v4547_v42 }
 0x16b   :  { %4328 = vmatprep.subr.bf16.mxu0 %v4549_v46  ;;  %4309 = vmatpush3.bf16.msra.mxu1 %v4554_v62 }
 0x16e   :  { %4329 = vmatpush3.bf16.msra.mxu0 %v4551_v51 }
 0x16f   :  { %4330 = vmatprep.subr.bf16.mxu0 %v4553_v59 }
 0x172   :  { %4331 = vmatpush3.bf16.msra.mxu0 %v4555_v0 }
 0x20e   :  { %v4272_v34 = vpop.f32.mrf.mxu1 }
 0x210   :  { %v4273_v37 = vpop.f32.mrf.mxu1 }
 0x211   :  { %v4274_v52 = vadd.f32 %v4273_v37, %v4272_v34 }
 0x212   :  { %v4275_v40 = vpop.f32.mrf.mxu1 }
 0x214   :  { %v4276_v43 = vpop.f32.mrf.mxu1 }
 0x215   :  { %v4433_v45 = vpop.f32.mrf.mxu0  ;;  %v4277_v53 = vadd.f32 %v4276_v43, %v4275_v40  ;;  %v4152_v43 = vld [vmem:[%s5564_s6] ss:$0 sm:$0xff] }
 0x216   :  { %v4278_v47 = vpop.f32.mrf.mxu1 }
 0x217   :  { %v1090_v49 = vpop.f32.mrf.mxu0 }
 0x218   :  { %v4279_v55 = vpop.f32.mrf.mxu1  ;;  %v1091_v1 = vadd.f32 %v4274_v52, %v1090_v49 }
 0x219   :  { %v4434_v56 = vpop.f32.mrf.mxu0  ;;  %v4280_v57 = vadd.f32 %v4279_v55, %v4278_v47 }
 0x21a   :  { %v4281_v61 = vpop.f32.mrf.mxu1 }
 0x21b   :  { %v1093_v63 = vpop.f32.mrf.mxu0  ;;  %v1099_v3 = vadd.f32 %v4433_v45, %v4280_v57 }
 0x21c   :  { %v1094_v2 = vadd.f32 %v4277_v53, %v1093_v63  ;;  %v4282_v58 = vpop.f32.mrf.mxu1 }
 0x21d   :  { %v4283_v4 = vadd.f32 %v4282_v58, %v4281_v61 }
 0x21e   :  { %v1105_v6 = vadd.f32 %v1094_v2, %v1091_v1 }
 0x21f   :  { %v1102_v7 = vadd.f32 %v4434_v56, %v4283_v4 }
 0x220   :  { %v1106_v8 = vadd.f32 %v1105_v6, %v1099_v3 }
 0x221   :  { %v1107_v10 = vsel %vm319_vm1, %v1102_v7, 0.0 }
 0x222   :  { %v1108_v12 = vadd.f32 %v1107_v10, %v1106_v8 }
 0x224   :  { %v1109_v9 = vrot.slane %v1108_v12, 4 }
 0x226   :  { %v1110_v13 = vadd.f32 %v1109_v9, %v1108_v12 }
 0x228   :  { %v1111_v14 = vrot.slane %v1110_v13, 2 }
 0x22a   :  { %v1112_v15 = vadd.f32 %v1111_v14, %v1110_v13 }
 0x22c   :  { %v1113_v16 = vrot.slane %v1112_v15, 1 }
 0x22e   :  { %v1114_v17 = vadd.f32 %v1113_v16, %v1112_v15 }
 0x230   :  { %v1115_v18 = vmul.f32 0.035714287, %v1114_v17 }
 0x232   :  { %v1116_v19 = vsub.f32 %v1091_v1, %v1115_v18  ;;  %v1117_v20 = vsub.f32 %v1094_v2, %v1115_v18  ;;  %v1118_v21 = vsub.f32 %v1099_v3, %v1115_v18  ;;  %v1119_v22 = vsub.f32 %v1102_v7, %v1115_v18 }
 0x234   :  { %v1120_v23 = vmul.f32 %v1116_v19, %v1116_v19  ;;  %v1121_v24 = vmul.f32 %v1117_v20, %v1117_v20  ;;  %v1123_v25 = vmul.f32 %v1119_v22, %v1119_v22  ;;  %v1122_v26 = vmul.f32 %v1118_v21, %v1118_v21 }
 0x236   :  { %v1124_v27 = vadd.f32 %v1121_v24, %v1120_v23  ;;  %v1126_v29 = vsel %vm319_vm1, %v1123_v25, 0.0 }
 0x238   :  { %v1125_v28 = vadd.f32 %v1124_v27, %v1122_v26 }
 0x23a   :  { %v1127_v30 = vadd.f32 %v1126_v29, %v1125_v28 }
 0x23c   :  { %v1128_v31 = vrot.slane %v1127_v30, 4 }
 0x23e   :  { %v1129_v32 = vadd.f32 %v1128_v31, %v1127_v30 }
 0x240   :  { %v1130_v33 = vrot.slane %v1129_v32, 2 }
 0x242   :  { %v1131_v34 = vadd.f32 %v1130_v33, %v1129_v32 }
 0x244   :  { %v1132_v35 = vrot.slane %v1131_v34, 1 }
 0x246   :  { %v1133_v36 = vadd.f32 %v1132_v35, %v1131_v34 }
 0x248   :  { %v1134_v37 = vmul.f32 0.035714287, %v1133_v36 }
 0x24a   :  { %v1135_v38 = vadd.f32 1e-05, %v1134_v37 }
 0x24c   :  { %4614 = vrsqrt.f32 %v1135_v38  ;;  %v5032_v38 = vsub.s32 1, %v4727_v5 }
 0x259   :  { %v4615_v40 = vpop.eup %4614 }
 0x25a   :  { %v1137_v41 = vmul.f32 %v4615_v40, %v484_v39 }
 0x25c   :  { %v1141_v42 = vrot.slane %v1137_v41, %v4838_v50 }
 0x25e   :  { %v1142_v44 = vmul.f32 %v1141_v42, %v1116_v19  ;;  %v1143_v45 = vmul.f32 %v1141_v42, %v1117_v20  ;;  %v1144_v46 = vmul.f32 %v1141_v42, %v1118_v21  ;;  %v1145_v47 = vmul.f32 %v1141_v42, %v1119_v22 }
 0x260   :  { %v1152_v48 = vadd.f32 %v4152_v43, %v1142_v44  ;;  %v1153_v49 = vadd.f32 %v4152_v43, %v1143_v45  ;;  %v1154_v51 = vadd.f32 %v4152_v43, %v1144_v46  ;;  %v1155_v52 = vadd.f32 %v4152_v43, %v1145_v47 }
 0x262   :  { %v1156_v53 = vmax.f32 %v1152_v48, 0.0  ;;  %v1157_v55 = vmax.f32 %v1153_v49, 0.0  ;;  %v1158_v54 = vmax.f32 %v1154_v51, 0.0  ;;  %v1159_v56 = vmax.f32 %v1155_v52, 0.0 }
 0x264   :  { %v1164_v57 = vcombine.high %v1156_v53, %v1156_v53  ;;  %v1171_v59 = vrot.slane %v1156_v53, %v4845_v60  ;;  %v1181_v61 = vcombine.high %v1157_v55, %v1157_v55  ;;  %v1188_v62 = vrot.slane %v1157_v55, %v4845_v60 }
 0x265   :  { %v1198_v63 = vcombine.high %v1158_v54, %v1158_v54  ;;  %v1205_v0 = vrot.slane %v1158_v54, %v4845_v60  ;;  %v1221_v1 = vrot.slane %v1159_v56, %v4845_v60 }
 0x266   :  { %v1178_v2 = vrot.slane %v1164_v57, %v4845_v60  ;;  %v1179_v3 = vcombine.high %v1171_v59, %v1171_v59  ;;  %v1195_v58 = vrot.slane %v1181_v61, %v4845_v60  ;;  %v1196_v4 = vcombine.high %v1188_v62, %v1188_v62 }
 0x267   :  { %v1212_v6 = vrot.slane %v1198_v63, %v4845_v60  ;;  %v1213_v7 = vcombine.high %v1205_v0, %v1205_v0  ;;  %v1222_v14 = vcombine.high %v1221_v1, %v1221_v1 }
 0x268   :  { %v1180_v8 = vcombine.high %v1178_v2, %v1178_v2  ;;  %v1197_v10 = vcombine.high %v1195_v58, %v1195_v58  ;;  %v1289_v12 = vcombine.low %v1171_v59, %v1179_v3  ;;  %v1306_v9 = vcombine.low %v1188_v62, %v1196_v4 }
 0x269   :  { %v1214_v13 = vcombine.high %v1212_v6, %v1212_v6  ;;  %v1323_v15 = vcombine.low %v1213_v7, %v1212_v6  ;;  %v1320_v18 = vrot.slane %v1195_v58, %v4845_v60  ;;  %v1353_v27 = vrot.slane %v1222_v14, %v4845_v60 }
 0x26a   :  { %v1290_v16 = vcombine.low %v1178_v2, %v1180_v8  ;;  %v1313_v17 = vrot.slane %v1306_v9, %v4845_v60  ;;  %v1322_v19 = vcombine.low %v1197_v10, %v1205_v0  ;;  %v1297_v20 = vrot.slane %v1289_v12, %v4845_v60 }
 0x26b   :  { %v1339_v21 = vcombine.low %v1214_v13, %v1221_v1  ;;  %v1337_v25 = vrot.slane %v1323_v15, %v4845_v60 }
 0x26c   :  { %v1304_v22 = vrot.slane %v1290_v16, %v4845_v60  ;;  %v1321_v23 = vcombine.low %v1313_v17, %v1320_v18  ;;  %v1330_v24 = vrot.slane %v1322_v19, %v4845_v60 }
 0x26d   :  { %v1346_v26 = vrot.slane %v1339_v21, %v4845_v60 }
 0x26e   :  { %v1305_v28 = vcombine.low %v1297_v20, %v1304_v22  ;;  %v1338_v29 = vcombine.low %v1330_v24, %v1337_v25  ;;  %v1356_v32 = vrot.slane %v1321_v23, 7 }
 0x26f   :  { %v1354_v30 = vcombine.low %v1346_v26, %v1353_v27 }
 0x270   :  { %v1355_v31 = vrot.slane %v1305_v28, 7  ;;  %v1358_v33 = vrot.slane %v1338_v29, 7 }
 0x271   :  { %v1359_v34 = vrot.slane %v1354_v30, 7 }
 0x272   :  { %v1357_v35 = vsel %vm552_vm2, %v1355_v31, %v1356_v32  ;;  %v1365_v36 = vsel %vm552_vm2, 0.0, %v1355_v31  ;;  %v1366_v37 = vsel %vm552_vm2, 0.0, %v1358_v33 }
 0x273   :  { %v1360_v39 = vsel %vm552_vm2, %v1358_v33, %v1359_v34  ;;  %v1367_v40 = vsel %vm565_vm3, %v1357_v35, 0.0  ;;  %v1373_v41 = vcombine.high %v1365_v36, %v1365_v36  ;;  %v5037_v42 = vrot.slane %v1365_v36, %v4845_v60 }
 0x274   :  { %v1368_v43 = vsel %vm565_vm3, %v1360_v39, 0.0  ;;  %v1390_v44 = vcombine.high %v1367_v40, %v1367_v40  ;;  %v1397_v45 = vrot.slane %v1367_v40, %v4845_v60  ;;  %v1407_v46 = vcombine.high %v1366_v37, %v1366_v37 }
 0x275   :  { %v1387_v47 = vrot.slane %v1373_v41, %v4845_v60  ;;  %v1388_v5 = vcombine.high %v5037_v42, %v5037_v42  ;;  %v1414_v48 = vrot.slane %v1366_v37, %v4845_v60  ;;  %v1424_v49 = vcombine.high %v1368_v43, %v1368_v43 }
 0x276   :  { %v1421_v51 = vrot.slane %v1407_v46, %v4845_v60  ;;  %v1431_v52 = vrot.slane %v1368_v43, %v4845_v60  ;;  %v1444_v53 = vrot.slane %v5037_v42, %v4838_v50  ;;  %v1518_v55 = vrot.slane %v5037_v42, %v5032_v38 }
 0x277   :  { %v1389_v54 = vcombine.high %v1387_v47, %v1387_v47  ;;  %v1422_v56 = vcombine.high %v1414_v48, %v1414_v48  ;;  %v1438_v57 = vrot.slane %v1424_v49, %v4845_v60  ;;  %v1448_v59 = vrot.slane %v1388_v5, %v4838_v50 }
 0x278   :  { %v1423_v61 = vcombine.high %v1421_v51, %v1421_v51  ;;  %v1439_v62 = vcombine.high %v1431_v52, %v1431_v52  ;;  %v1452_v63 = vrot.slane %v1387_v47, %v4838_v50  ;;  %v1472_v0 = vrot.slane %v1414_v48, %v4838_v50 }
 0x279   :  { %v1476_v1 = vrot.slane %v1422_v56, %v4838_v50  ;;  %v1480_v2 = vrot.slane %v1421_v51, %v4838_v50  ;;  %v1488_v3 = vrot.slane %v1431_v52, %v4838_v50  ;;  %v1522_v58 = vrot.slane %v1388_v5, %v5032_v38 }
 0x27a   :  { %v1526_v4 = vrot.slane %v1387_v47, %v5032_v38  ;;  %v1546_v6 = vrot.slane %v1414_v48, %v5032_v38  ;;  %v1550_v7 = vrot.slane %v1422_v56, %v5032_v38  ;;  %v1554_v8 = vrot.slane %v1421_v51, %v5032_v38 }
 0x27b   :  { %v5064_v10 = vrot.slane %v1431_v52, %v5032_v38  ;;  %v1404_v12 = vrot.slane %v1390_v44, %v4845_v60  ;;  %v1405_v9 = vcombine.high %v1397_v45, %v1397_v45  ;;  %v5067_v13 = vcombine.high %v1438_v57, %v1438_v57 }
 0x27c   :  { %v1456_v14 = vrot.slane %v1389_v54, %v4838_v50  ;;  %v1460_v15 = vrot.slane %v1397_v45, %v4838_v50  ;;  %v1484_v16 = vrot.slane %v1423_v61, %v4838_v50  ;;  %v1492_v17 = vrot.slane %v1439_v62, %v4838_v50 }
 0x27d   :  { %v5073_v18 = vcombine.high %v1404_v12, %v1404_v12  ;;  %v1464_v19 = vrot.slane %v1405_v9, %v4838_v50  ;;  %v1468_v20 = vrot.slane %v1404_v12, %v4838_v50  ;;  %v1496_v21 = vrot.slane %v1438_v57, %v4838_v50 }
 0x27e   :  { %v1498_v60 = vsel %vm1497_vm5, %v1448_v59, %v1444_v53  ;;  %v1509_v22 = vsel %vm1497_vm5, %v1476_v1, %v1472_v0  ;;  %v1530_v23 = vrot.slane %v1389_v54, %v5032_v38  ;;  %v1534_v24 = vrot.slane %v1397_v45, %v5032_v38 }
 0x27f   :  { %v1500_v25 = vsel %vm1499_vm6, %v1452_v63, %v1498_v60  ;;  %v1510_v26 = vsel %vm1499_vm6, %v1480_v2, %v1509_v22  ;;  %v1538_v27 = vrot.slane %v1405_v9, %v5032_v38  ;;  %v1542_v28 = vrot.slane %v1404_v12, %v5032_v38 }
 0x280   :  { %v1502_v29 = vsel %vm1501_vm7, %v1456_v14, %v1500_v25  ;;  %v1511_v30 = vsel %vm1501_vm7, %v1484_v16, %v1510_v26  ;;  %v1558_v31 = vrot.slane %v1423_v61, %v5032_v38  ;;  %v1566_v32 = vrot.slane %v1439_v62, %v5032_v38 }
 0x281   :  { %v1504_v33 = vsel %vm1503_vm8, %v1460_v15, %v1502_v29  ;;  %v1512_v34 = vsel %vm1503_vm8, %v1488_v3, %v1511_v30  ;;  %v1570_v35 = vrot.slane %v1438_v57, %v5032_v38  ;;  %v1571_v36 = vsel %vm1497_vm5, %v1522_v58, %v1518_v55 }
 0x282   :  { %v1506_v37 = vsel %vm1505_vm9, %v1464_v19, %v1504_v33  ;;  %v1513_v39 = vsel %vm1505_vm9, %v1492_v17, %v1512_v34  ;;  %v1572_v40 = vsel %vm1499_vm6, %v1526_v4, %v1571_v36  ;;  %v1577_v41 = vsel %vm1497_vm5, %v1550_v7, %v1546_v6 }
 0x283   :  { %v1508_v42 = vsel %vm1507_vm10, %v1468_v20, %v1506_v37  ;;  %v1514_v43 = vsel %vm1507_vm10, %v1496_v21, %v1513_v39  ;;  %v1573_v44 = vsel %vm1501_vm7, %v1530_v23, %v1572_v40  ;;  %v1578_v45 = vsel %vm1499_vm6, %v1554_v8, %v1577_v41 }
 0x284   :  { %v1574_v46 = vsel %vm1503_vm8, %v1534_v24, %v1573_v44  ;;  %v1579_v47 = vsel %vm1501_vm7, %v1558_v31, %v1578_v45  ;;  %v1586_v5 = vrot.slane %v5073_v18, %v4838_v50  ;;  %v1590_v48 = vrot.slane %v5067_v13, %v4838_v50 }
 0x285   :  { %v1575_v49 = vsel %vm1505_vm9, %v1538_v27, %v1574_v46  ;;  %v1580_v51 = vsel %vm1503_vm8, %v5064_v10, %v1579_v47  ;;  %v1591_v52 = vsel %vm1497_vm5, %v1452_v63, %v1448_v59  ;;  %v1597_v53 = vsel %vm1497_vm5, %v1480_v2, %v1476_v1 }
 0x286   :  { %v1576_v55 = vsel %vm1507_vm10, %v1542_v28, %v1575_v49  ;;  %v1581_v54 = vsel %vm1505_vm9, %v1566_v32, %v1580_v51  ;;  %v1592_v56 = vsel %vm1499_vm6, %v1456_v14, %v1591_v52  ;;  %v1598_v57 = vsel %vm1499_vm6, %v1484_v16, %v1597_v53 }
 0x287   :  { %v1582_v61 = vsel %vm1507_vm10, %v1570_v35, %v1581_v54  ;;  %v1593_v62 = vsel %vm1501_vm7, %v1460_v15, %v1592_v56  ;;  %v1599_v0 = vsel %vm1501_vm7, %v1488_v3, %v1598_v57  ;;  %v1606_v6 = vrot.slane %v5073_v18, %v5032_v38 }
 0x288   :  { %v1594_v59 = vsel %vm1503_vm8, %v1464_v19, %v1593_v62  ;;  %v1600_v63 = vsel %vm1503_vm8, %v1492_v17, %v1599_v0  ;;  %v1610_v1 = vrot.slane %v5067_v13, %v5032_v38  ;;  %v1611_v2 = vsel %vm1497_vm5, %v1526_v4, %v1522_v58 }
 0x289   :  { %v1595_v12 = vsel %vm1505_vm9, %v1468_v20, %v1594_v59  ;;  %v1601_v9 = vsel %vm1505_vm9, %v1496_v21, %v1600_v63  ;;  %v1612_v14 = vsel %vm1499_vm6, %v1530_v23, %v1611_v2  ;;  %v1617_v3 = vsel %vm1497_vm5, %v1554_v8, %v1550_v7 }
 0x28a   :  { %v1596_v15 = vsel %vm1507_vm10, %v1586_v5, %v1595_v12  ;;  %v1602_v16 = vsel %vm1507_vm10, %v1590_v48, %v1601_v9  ;;  %v1613_v18 = vsel %vm1501_vm7, %v1534_v24, %v1612_v14  ;;  %v1618_v17 = vsel %vm1499_vm6, %v1558_v31, %v1617_v3 }
 0x28b   :  { %v1614_v38 = vsel %vm1503_vm8, %v1538_v27, %v1613_v18  ;;  %v1619_v58 = vsel %vm1501_vm7, %v5064_v10, %v1618_v17  ;;  %v1623_v4 = vcombine.low %v1508_v42, %v1576_v55  ;;  %v1624_v13 = vcombine.high %v1508_v42, %v1576_v55 }
 0x28c   :  { %v1615_v19 = vsel %vm1505_vm9, %v1542_v28, %v1614_v38  ;;  %v1620_v20 = vsel %vm1503_vm8, %v1566_v32, %v1619_v58  ;;  %v1690_v7 = vcombine.low %v1514_v43, %v1582_v61  ;;  %v1691_v8 = vcombine.high %v1514_v43, %v1582_v61 }
 0x28d   :  { %v1616_v21 = vsel %vm1507_vm10, %v1606_v6, %v1615_v19  ;;  %v1621_v60 = vsel %vm1505_vm9, %v1570_v35, %v1620_v20  ;;  %v1633_v22 = vrot.slane %v1623_v4, %v4736_v11  ;;  %v1640_v10 = vrot.slane %v1624_v13, %v4736_v11 }
 0x28e   :  { %v1622_v23 = vsel %vm1507_vm10, %v1610_v1, %v1621_v60  ;;  %v1625_v24 = vcombine.low %v1596_v15, %v1616_v21  ;;  %v1626_v25 = vcombine.high %v1596_v15, %v1616_v21  ;;  %v1700_v28 = vrot.slane %v1690_v7, %v4736_v11 }
 0x28f   :  { %v1692_v26 = vcombine.low %v1602_v16, %v1622_v23  ;;  %v1693_v27 = vcombine.high %v1602_v16, %v1622_v23  ;;  %v1707_v29 = vrot.slane %v1691_v8, %v4736_v11 }
 0x290   :  { %v1647_v30 = vrot.slane %v1625_v24, %v4736_v11  ;;  %v1654_v31 = vrot.slane %v1626_v25, %v4736_v11 }
 0x291   :  { %v1714_v32 = vrot.slane %v1692_v26, %v4736_v11  ;;  %v1721_v33 = vrot.slane %v1693_v27, %v4736_v11 }
 0x292   :  { %v1655_v34 = vcombine.low %v1633_v22, %v1647_v30  ;;  %v1656_v35 = vcombine.high %v1633_v22, %v1647_v30  ;;  %v1657_v36 = vcombine.low %v1640_v10, %v1654_v31  ;;  %v1658_v37 = vcombine.high %v1640_v10, %v1654_v31 }
 0x293   :  { %v1722_v39 = vcombine.low %v1700_v28, %v1714_v32  ;;  %v1723_v40 = vcombine.high %v1700_v28, %v1714_v32  ;;  %v1724_v41 = vcombine.low %v1707_v29, %v1721_v33  ;;  %v1725_v42 = vcombine.high %v1707_v29, %v1721_v33  ;;  %v4556_v33 = vld [vmem:[%s5565_s10 + $0x78] sm:$0xff]  }
 0x294   :  { %v1665_v43 = vrot.slane %v1655_v34, %v4736_v11  ;;  %v1672_v44 = vrot.slane %v1657_v36, %v4736_v11  ;;  %v1679_v45 = vrot.slane %v1656_v35, %v4736_v11  ;;  %v1686_v46 = vrot.slane %v1658_v37, %v4736_v11  ;;  %v4557_v35 = vld [vmem:[%s5565_s10 + $0xb8] sm:$0xff]   ;;  %4338 = vmatprep.subr.bf16.mxu1 %v4556_v33  ;;  %v4559_v37 = vld [vmem:[%s5565_s10 + $0x70] sm:$0xff]   ;;  %v1287_v33 = vld [vmem:[%s5566_s8] sm:$0x1] }
 0x295   :  { %v1732_v47 = vrot.slane %v1722_v39, %v4736_v11  ;;  %v1739_v5 = vrot.slane %v1724_v41, %v4736_v11  ;;  %v1746_v48 = vrot.slane %v1723_v40, %v4736_v11  ;;  %v1753_v55 = vrot.slane %v1725_v42, %v4736_v11  ;;  %v4558_v36 = vld [vmem:[%s5565_s10 + $0x38] sm:$0xff]   ;;  %v4560_v39 = vld [vmem:[%s5565_s10 + $0xb0] sm:$0xff]   ;;  %v4562_v41 = vld [vmem:[%s5565_s10 + $0x68] sm:$0xff]  }
 0x296   :  { %v1688_v49 = vcombine.high %v1672_v44, %v1672_v44  ;;  %v1757_v51 = vcombine.low %v1665_v43, %v1679_v45  ;;  %v4153_v52 = vcombine.high %v1665_v43, %v1679_v45  ;;  %v1759_v53 = vcombine.low %v1672_v44, %v1686_v46  ;;  %v4561_v40 = vld [vmem:[%s5565_s10 + $0x30] sm:$0xff]   ;;  %v4563_v42 = vld [vmem:[%s5565_s10 + $0xa8] sm:$0xff]   ;;  %v4565_v44 = vld [vmem:[%s5565_s10 + $0x60] sm:$0xff]  }
 0x297   :  { %v1754_v54 = vcombine.high %v1732_v47, %v1732_v47  ;;  %v1755_v56 = vcombine.high %v1739_v5, %v1739_v5  ;;  %v1756_v57 = vcombine.high %v1746_v48, %v1746_v48  ;;  %v4624_v34 = vmov 0.0   ;;  %v4564_v43 = vld [vmem:[%s5565_s10 + $0x28] sm:$0xff]   ;;  %v4566_v45 = vld [vmem:[%s5565_s10 + $0xa0] sm:$0xff]  }
 0x298   :  { %v1760_v61 = vcombine.low %v1688_v49, %v1732_v47  ;;  %v1767_v62 = vrot.slane %v1757_v51, %v4736_v11  ;;  %v1774_v0 = vrot.slane %v4153_v52, %v4736_v11  ;;  %v1781_v1 = vrot.slane %v1759_v53, %v4736_v11  ;;  %4435 = vmatprep.subr.bf16.mxu0 %v4624_v34  ;;  %v4567_v46 = vld [vmem:[%s5565_s10 + $0x20] sm:$0xff]   ;;  %v4568_v47 = vld [vmem:[%s5565_s10 + $0x58] sm:$0xff]   ;;  %v4571_v49 = vld [vmem:[%s5565_s10 + $0x50] sm:$0xff]  }
 0x299   :  { %v1825_v6 = vcombine.low %v1746_v48, %v1754_v54  ;;  %v1826_v59 = vcombine.low %v1756_v57, %v1739_v5  ;;  %v1827_v63 = vcombine.low %v1753_v55, %v1755_v56  ;;  %v4569_v5 = vld [vmem:[%s5565_s10 + $0x98] sm:$0xff]   ;;  %v4572_v51 = vld [vmem:[%s5565_s10 + $0x90] sm:$0xff]   ;;  %v4574_v53 = vld [vmem:[%s5565_s10 + $0x48] sm:$0xff]  }
 0x29a   :  { %v1788_v2 = vrot.slane %v1760_v61, %v4736_v11  ;;  %v1789_v12 = vcombine.low %v1767_v62, %v1774_v0  ;;  %v1790_v9 = vcombine.high %v1767_v62, %v1774_v0  ;;  %v4570_v48 = vld [vmem:[%s5565_s10 + $0x18] sm:$0xff]   ;;  %v4573_v52 = vld [vmem:[%s5565_s10 + $0x10] sm:$0xff]   ;;  %v4575_v55 = vld [vmem:[%s5565_s10 + $0x88] sm:$0xff]  }
 0x29b   :  { %v1834_v14 = vrot.slane %v1825_v6, %v4736_v11  ;;  %v1841_v3 = vrot.slane %v1826_v59, %v4736_v11  ;;  %v1848_v15 = vrot.slane %v1827_v63, %v4736_v11  ;;  %v4576_v54 = vld [vmem:[%s5565_s10 + $0x8] sm:$0xff]   ;;  %v4577_v56 = vld [vmem:[%s5565_s10 + $0x40] sm:$0xff]  }
 0x29c   :  { %v1791_v16 = vcombine.low %v1781_v1, %v1788_v2  ;;  %v1792_v18 = vcombine.high %v1781_v1, %v1788_v2  ;;  %v1806_v4 = vrot.slane %v1790_v9, %v4736_v11  ;;  %v1799_v19 = vrot.slane %v1789_v12, %v4736_v11  ;;  %v4578_v57 = vld [vmem:[%s5565_s10 + $0x80] sm:$0xff]  }
 0x29d   :  { %v1849_v17 = vcombine.low %v1834_v14, %v1841_v3  ;;  %v1850_v38 = vcombine.high %v1834_v14, %v1841_v3  ;;  %v1851_v58 = vcombine.high %v1848_v15, %v1848_v15  ;;  %v1872_v8 = vrot.slane %v1848_v15, %v4736_v11  ;;  %v4579_v61 = vld [vmem:[%s5565_s10] sm:$0xff]  }
 0x29e   :  { %v1820_v13 = vrot.slane %v1792_v18, %v4736_v11  ;;  %v1813_v20 = vrot.slane %v1791_v16, %v4736_v11 }
 0x29f   :  { %v1865_v7 = vrot.slane %v1850_v38, %v4736_v11  ;;  %v1879_v21 = vrot.slane %v1851_v58, %v4736_v11  ;;  %v1858_v60 = vrot.slane %v1849_v17, %v4736_v11 }
 0x2a0   :  { %v1823_v22 = vcombine.low %v1806_v4, %v1820_v13  ;;  %v1824_v23 = vcombine.high %v1806_v4, %v1820_v13  ;;  %v1821_v24 = vcombine.low %v1799_v19, %v1813_v20  ;;  %v1822_v25 = vcombine.high %v1799_v19, %v1813_v20 }
 0x2a1   :  { %v1882_v10 = vcombine.low %v1865_v7, %v1879_v21  ;;  %v1883_v26 = vcombine.high %v1865_v7, %v1879_v21  ;;  %v1880_v27 = vcombine.low %v1858_v60, %v1872_v8  ;;  %v1881_v28 = vcombine.high %v1858_v60, %v1872_v8 }
 0x2a3   :  { %v1893_v29 = vpack.c.bf16 %v1882_v10, %v1823_v22  ;;  %v1895_v30 = vpack.c.bf16 %v1883_v26, %v1824_v23  ;;  %v1892_v31 = vpack.c.bf16 %v1880_v27, %v1821_v24  ;;  %v1894_v32 = vpack.c.bf16 %v1881_v28, %v1822_v25 }
 0x2a5   :  { %2120 = vmatprep.mubr.bf16.mxu1 %v1893_v29  ;;  %2161 = vmatprep.mubr.bf16.mxu0 %v1895_v30 }
 0x2a6   :  { %2121 = vmatmul.mubr.bf16.vlgmr.msra.gmra.mxu1 %v1892_v31  ;;  %2162 = vmatmul.mubr.bf16.vlgmr.msra.gmra.mxu0 %v1894_v32 }
 0x2a7   :  { %4436 = vmatpush3.bf16.msra.mxu0 %v4557_v35  ;;  %4339 = vmatpush3.bf16.msra.mxu1 %v4558_v36 }
 0x2a8   :  { %4437 = vmatprep.subr.bf16.mxu0 %v4624_v34  ;;  %4340 = vmatprep.subr.bf16.mxu1 %v4559_v37 }
 0x2a9   :  { %4451 = vmatprep.mubr.msk.bf16.mxu0 %vm4625_vm11, %v4624_v34 }
 0x2ab   :  { %4438 = vmatpush3.bf16.msra.mxu0 %v4560_v39  ;;  %4341 = vmatpush3.bf16.msra.mxu1 %v4561_v40  ;;  %v4186_v39 = vld [vmem:[%s5567_s9] ss:$0 sm:$0xff] }
 0x2ac   :  { %4439 = vmatprep.subr.bf16.mxu0 %v4624_v34  ;;  %4342 = vmatprep.subr.bf16.mxu1 %v4562_v41 }
 0x2af   :  { %4440 = vmatpush3.bf16.msra.mxu0 %v4563_v42  ;;  %4343 = vmatpush3.bf16.msra.mxu1 %v4564_v43 }
 0x2b0   :  { %4441 = vmatprep.subr.bf16.mxu0 %v4624_v34  ;;  %4344 = vmatprep.subr.bf16.mxu1 %v4565_v44 }
 0x2b3   :  { %4442 = vmatpush3.bf16.msra.mxu0 %v4566_v45  ;;  %4345 = vmatpush3.bf16.msra.mxu1 %v4567_v46 }
 0x2b4   :  { %4443 = vmatprep.subr.bf16.mxu0 %v4624_v34  ;;  %4346 = vmatprep.subr.bf16.mxu1 %v4568_v47 }
 0x2b7   :  { %4444 = vmatpush3.bf16.msra.mxu0 %v4569_v5  ;;  %4347 = vmatpush3.bf16.msra.mxu1 %v4570_v48 }
 0x2b8   :  { %4445 = vmatprep.subr.bf16.mxu0 %v4624_v34  ;;  %4348 = vmatprep.subr.bf16.mxu1 %v4571_v49 }
 0x2bb   :  { %4446 = vmatpush3.bf16.msra.mxu0 %v4572_v51  ;;  %4349 = vmatpush3.bf16.msra.mxu1 %v4573_v52 }
 0x2bc   :  { %4447 = vmatprep.subr.bf16.mxu0 %v4624_v34  ;;  %4350 = vmatprep.subr.bf16.mxu1 %v4574_v53 }
 0x2bf   :  { %4448 = vmatpush3.bf16.msra.mxu0 %v4575_v55  ;;  %4351 = vmatpush3.bf16.msra.mxu1 %v4576_v54 }
 0x2c0   :  { %4449 = vmatprep.subr.bf16.mxu0 %v4624_v34  ;;  %4352 = vmatprep.subr.bf16.mxu1 %v4577_v56 }
 0x2c3   :  { %4450 = vmatpush3.bf16.msra.mxu0 %v4578_v57  ;;  %4353 = vmatpush3.bf16.msra.mxu1 %v4579_v61 }
 0x2c4   :  { %4455 = vmatprep.subr.bf16.mxu0 %v4624_v34 }
 0x366   :  { %v4310_v62 = vpop.f32.mrf.mxu1  ;;  %v4332_v0 = vpop.f32.mrf.mxu0 }
 0x368   :  { %v4311_v6 = vpop.f32.mrf.mxu1  ;;  %v4333_v59 = vpop.f32.mrf.mxu0 }
 0x369   :  { %v4312_v2 = vadd.f32 %v4311_v6, %v4310_v62  ;;  %v4334_v12 = vadd.f32 %v4333_v59, %v4332_v0 }
 0x36a   :  { %v4313_v63 = vpop.f32.mrf.mxu1  ;;  %v4335_v1 = vpop.f32.mrf.mxu0 }
 0x36b   :  { %v2164_v18 = vadd.f32 %v4334_v12, %v4312_v2 }
 0x36c   :  { %v4314_v9 = vpop.f32.mrf.mxu1  ;;  %v4336_v14 = vpop.f32.mrf.mxu0 }
 0x36d   :  { %v4315_v3 = vadd.f32 %v4314_v9, %v4313_v63  ;;  %v4337_v15 = vadd.f32 %v4336_v14, %v4335_v1 }
 0x36f   :  { %v2167_v16 = vadd.f32 %v4337_v15, %v4315_v3 }
 0x371   :  { %v2170_v17 = vsel %vm578_vm4, %v2167_v16, 0.0 }
 0x372   :  { %v2171_v38 = vadd.f32 %v2170_v17, %v2164_v18 }
 0x374   :  { %v2172_v58 = vrot.slane %v2171_v38, 4 }
 0x376   :  { %v2173_v4 = vadd.f32 %v2172_v58, %v2171_v38 }
 0x378   :  { %v2174_v13 = vrot.slane %v2173_v4, 2 }
 0x37a   :  { %v2175_v19 = vadd.f32 %v2174_v13, %v2173_v4 }
 0x37c   :  { %v2176_v20 = vrot.slane %v2175_v19, 1 }
 0x37e   :  { %v2177_v7 = vadd.f32 %v2176_v20, %v2175_v19 }
 0x380   :  { %v2178_v8 = vmul.f32 0.071428575, %v2177_v7 }
 0x382   :  { %v2179_v21 = vsub.f32 %v2164_v18, %v2178_v8  ;;  %v2180_v60 = vsub.f32 %v2167_v16, %v2178_v8 }
 0x384   :  { %v2181_v22 = vmul.f32 %v2179_v21, %v2179_v21  ;;  %v2182_v23 = vmul.f32 %v2180_v60, %v2180_v60 }
 0x386   :  { %v2183_v24 = vsel %vm578_vm4, %v2182_v23, 0.0 }
 0x387   :  { %v2184_v25 = vadd.f32 %v2183_v24, %v2181_v22 }
 0x389   :  { %v2185_v10 = vrot.slane %v2184_v25, 4 }
 0x38b   :  { %v2186_v26 = vadd.f32 %v2185_v10, %v2184_v25 }
 0x38d   :  { %v2187_v27 = vrot.slane %v2186_v26, 2 }
 0x38f   :  { %v2188_v28 = vadd.f32 %v2187_v27, %v2186_v26 }
 0x391   :  { %v2189_v29 = vrot.slane %v2188_v28, 1 }
 0x393   :  { %v2190_v30 = vadd.f32 %v2189_v29, %v2188_v28 }
 0x395   :  { %v2191_v31 = vmul.f32 0.071428575, %v2190_v30  ;;  %v5291_v30 = vrot.slane %v4624_v34, 2 }
 0x397   :  { %v2192_v32 = vadd.f32 1e-05, %v2191_v31 }
 0x399   :  { %4616 = vrsqrt.f32 %v2192_v32 }
 0x3a6   :  { %v4617_v35 = vpop.eup %4616 }
 0x3a7   :  { %v2194_v36 = vmul.f32 %v4617_v35, %v1287_v33 }
 0x3a9   :  { %v2198_v37 = vrot.slane %v2194_v36, %v4838_v50 }
 0x3ab   :  { %v2199_v40 = vmul.f32 %v2198_v37, %v2179_v21  ;;  %v2200_v41 = vmul.f32 %v2198_v37, %v2180_v60 }
 0x3ad   :  { %v2207_v42 = vadd.f32 %v4186_v39, %v2199_v40  ;;  %v2208_v43 = vadd.f32 %v4186_v39, %v2200_v41 }
 0x3af   :  { %v2209_v44 = vmax.f32 %v2207_v42, 0.0  ;;  %v2210_v45 = vmax.f32 %v2208_v43, 0.0 }
 0x3b1   :  { %v2213_v46 = vcombine.high %v2209_v44, %v2209_v44  ;;  %v2220_v47 = vrot.slane %v2209_v44, %v4736_v11  ;;  %v2262_v5 = vcombine.high %v2210_v45, %v2210_v45  ;;  %v2269_v48 = vrot.slane %v2210_v45, %v4736_v11 }
 0x3b3   :  { %v2227_v49 = vrot.slane %v2213_v46, %v4736_v11  ;;  %v2228_v51 = vcombine.high %v2220_v47, %v2220_v47  ;;  %v2236_v52 = vrot.slane %v2220_v47, %v4736_v11  ;;  %v2276_v53 = vrot.slane %v2262_v5, %v4736_v11 }
 0x3b4   :  { %v2277_v55 = vcombine.high %v2269_v48, %v2269_v48  ;;  %v2285_v54 = vrot.slane %v2269_v48, %v4736_v11 }
 0x3b5   :  { %v2229_v56 = vcombine.high %v2227_v49, %v2227_v49  ;;  %v2243_v57 = vrot.slane %v2227_v49, %v4736_v11  ;;  %v2250_v61 = vrot.slane %v2228_v51, %v4736_v11  ;;  %v2258_v62 = vcombine.high %v2236_v52, %v2236_v52 }
 0x3b6   :  { %v2278_v0 = vcombine.high %v2276_v53, %v2276_v53  ;;  %v2292_v6 = vrot.slane %v2276_v53, %v4736_v11  ;;  %v2299_v59 = vrot.slane %v2277_v55, %v4736_v11  ;;  %v2359_v63 = vcombine.low %v2236_v52, %v2236_v52 }
 0x3b7   :  { %v2257_v1 = vrot.slane %v2229_v56, %v4736_v11  ;;  %v2259_v2 = vcombine.high %v2243_v57, %v2243_v57  ;;  %v2260_v12 = vcombine.high %v2250_v61, %v2250_v61  ;;  %v2360_v9 = vcombine.low %v2250_v61, %v2258_v62 }
 0x3b8   :  { %v2306_v14 = vrot.slane %v2278_v0, %v4736_v11  ;;  %v2369_v3 = vrot.slane %v2359_v63, %v4736_v11  ;;  %v2409_v15 = vcombine.low %v2285_v54, %v2299_v59  ;;  %v4188_v16 = vcombine.high %v2285_v54, %v2299_v59 }
 0x3b9   :  { %v2361_v18 = vcombine.low %v2260_v12, %v2243_v57  ;;  %v2362_v17 = vcombine.low %v2257_v1, %v2259_v2  ;;  %v2376_v38 = vrot.slane %v2360_v9, %v4736_v11  ;;  %v4187_v58 = vcombine.high %v2257_v1, %v2257_v1 }
 0x3ba   :  { %v2411_v4 = vcombine.low %v2292_v6, %v2306_v14  ;;  %v2425_v13 = vrot.slane %v2409_v15, %v4736_v11  ;;  %v2432_v21 = vrot.slane %v4188_v16, %v4736_v11 }
 0x3bb   :  { %v2383_v19 = vrot.slane %v2361_v18, %v4736_v11  ;;  %v2390_v20 = vrot.slane %v2362_v17, %v4736_v11  ;;  %v2391_v7 = vcombine.low %v2369_v3, %v2376_v38  ;;  %v2418_v8 = vrot.slane %v4187_v58, %v4736_v11 }
 0x3bc   :  { %v2439_v60 = vrot.slane %v2411_v4, %v4736_v11 }
 0x3bd   :  { %v2392_v22 = vcombine.low %v2383_v19, %v2390_v20  ;;  %v2440_v23 = vcombine.low %v2418_v8, %v2425_v13  ;;  %v2399_v25 = vrot.slane %v2391_v7, %v4736_v11 }
 0x3be   :  { %v2441_v24 = vcombine.low %v2432_v21, %v2439_v60 }
 0x3bf   :  { %v2406_v10 = vrot.slane %v2392_v22, %v4736_v11  ;;  %v2448_v26 = vrot.slane %v2440_v23, %v4736_v11 }
 0x3c0   :  { %v2455_v27 = vrot.slane %v2441_v24, %v4736_v11 }
 0x3c1   :  { %v2407_v28 = vcombine.low %v2399_v25, %v2406_v10 }
 0x3c2   :  { %v2456_v29 = vcombine.low %v2448_v26, %v2455_v27 }
 0x3c3   :  { %v2459_v31 = vsel %vm552_vm2, 0.0, %v2407_v28 }
 0x3c4   :  { %v2460_v32 = vsel %vm552_vm2, 0.0, %v2456_v29  ;;  %v2463_v33 = vrot.slane %v2459_v31, 1  ;;  %v2466_v35 = vrot.slane %v2459_v31, 2 }
 0x3c5   :  { %v2464_v36 = vrot.slane %v2460_v32, 1  ;;  %v2469_v37 = vrot.slane %v2460_v32, 2 }
 0x3c6   :  { %v2468_v39 = vsel %vm578_vm4, %v2466_v35, %v5291_v30  ;;  %v2471_v40 = vcombine.low %v2459_v31, %v2463_v33  ;;  %v2472_v41 = vcombine.high %v2459_v31, %v2463_v33 }
 0x3c7   :  { %v2470_v42 = vsel %vm578_vm4, %v2469_v37, %v5291_v30  ;;  %v2473_v43 = vcombine.high %v2468_v39, %v2468_v39  ;;  %v2494_v44 = vrot.slane %v2468_v39, %v4736_v11  ;;  %v2537_v45 = vcombine.low %v2460_v32, %v2464_v36 }
 0x3c8   :  { %v2480_v46 = vrot.slane %v2471_v40, %v4736_v11  ;;  %v2487_v47 = vrot.slane %v2472_v41, %v4736_v11  ;;  %v2538_v5 = vcombine.high %v2460_v32, %v2464_v36  ;;  %v2539_v48 = vcombine.high %v2470_v42, %v2470_v42 }
 0x3c9   :  { %v2501_v49 = vrot.slane %v2473_v43, %v4736_v11  ;;  %v2546_v51 = vrot.slane %v2537_v45, %v4736_v11  ;;  %v2560_v52 = vrot.slane %v2470_v42, %v4736_v11 }
 0x3ca   :  { %v2502_v53 = vcombine.low %v2480_v46, %v2494_v44  ;;  %v2503_v55 = vcombine.high %v2480_v46, %v2494_v44  ;;  %v2553_v54 = vrot.slane %v2538_v5, %v4736_v11  ;;  %v2567_v56 = vrot.slane %v2539_v48, %v4736_v11 }
 0x3cb   :  { %v2504_v57 = vcombine.low %v2487_v47, %v2501_v49  ;;  %v2505_v61 = vcombine.high %v2487_v47, %v2501_v49  ;;  %v2568_v62 = vcombine.low %v2546_v51, %v2560_v52  ;;  %v2569_v0 = vcombine.high %v2546_v51, %v2560_v52 }
 0x3cc   :  { %v2512_v6 = vrot.slane %v2502_v53, %v4736_v11  ;;  %v2526_v59 = vrot.slane %v2503_v55, %v4736_v11  ;;  %v2570_v63 = vcombine.low %v2553_v54, %v2567_v56  ;;  %v2571_v1 = vcombine.high %v2553_v54, %v2567_v56  ;;  %v4580_v53 = vld [vmem:[%s5568_s13 + $0x78] sm:$0xff]   ;;  %v4583_v56 = vld [vmem:[%s5568_s13 + $0x70] sm:$0xff]  }
 0x3cd   :  { %v2519_v2 = vrot.slane %v2504_v57, %v4736_v11  ;;  %v2533_v12 = vrot.slane %v2505_v61, %v4736_v11  ;;  %v2578_v9 = vrot.slane %v2568_v62, %v4736_v11  ;;  %v2592_v14 = vrot.slane %v2569_v0, %v4736_v11  ;;  %v4581_v55 = vld [vmem:[%s5568_s13 + $0xb8] sm:$0xff]   ;;  %4369 = vmatprep.subr.bf16.mxu1 %v4580_v53  ;;  %v4584_v57 = vld [vmem:[%s5568_s13 + $0xb0] sm:$0xff]   ;;  %v4586_v62 = vld [vmem:[%s5568_s13 + $0x68] sm:$0xff]  }
 0x3ce   :  { %v2585_v3 = vrot.slane %v2570_v63, %v4736_v11  ;;  %v2603_v15 = vcombine.low %v2512_v6, %v2526_v59  ;;  %v4189_v16 = vcombine.high %v2512_v6, %v2526_v59  ;;  %v2599_v4 = vrot.slane %v2571_v1, %v4736_v11  ;;  %v4582_v54 = vld [vmem:[%s5568_s13 + $0x38] sm:$0xff]   ;;  %v4585_v61 = vld [vmem:[%s5568_s13 + $0x30] sm:$0xff]   ;;  %v4587_v0 = vld [vmem:[%s5568_s13 + $0xa8] sm:$0xff]  }
 0x3cf   :  { %v2535_v18 = vcombine.high %v2519_v2, %v2519_v2  ;;  %v2600_v17 = vcombine.high %v2578_v9, %v2578_v9  ;;  %v2602_v38 = vcombine.high %v2592_v14, %v2592_v14  ;;  %v2605_v58 = vcombine.low %v2519_v2, %v2533_v12  ;;  %v4588_v6 = vld [vmem:[%s5568_s13 + $0x28] sm:$0xff]   ;;  %v4589_v59 = vld [vmem:[%s5568_s13 + $0x60] sm:$0xff]   ;;  %v4592_v2 = vld [vmem:[%s5568_s13 + $0x58] sm:$0xff]  }
 0x3d0   :  { %v2601_v13 = vcombine.high %v2585_v3, %v2585_v3  ;;  %v2613_v19 = vrot.slane %v2603_v15, %v4736_v11  ;;  %v2620_v20 = vrot.slane %v4189_v16, %v4736_v11  ;;  %v4590_v63 = vld [vmem:[%s5568_s13 + $0xa0] sm:$0xff]   ;;  %v4593_v12 = vld [vmem:[%s5568_s13 + $0x98] sm:$0xff]   ;;  %v4597_v15 = vld [vmem:[%s5568_s13 + $0x10] sm:$0xff]  }
 0x3d1   :  { %v2606_v7 = vcombine.low %v2535_v18, %v2578_v9  ;;  %v2670_v8 = vcombine.low %v2592_v14, %v2600_v17  ;;  %v2671_v21 = vcombine.low %v2602_v38, %v2585_v3  ;;  %v2627_v24 = vrot.slane %v2605_v58, %v4736_v11  ;;  %v4591_v1 = vld [vmem:[%s5568_s13 + $0x20] sm:$0xff]   ;;  %v4594_v9 = vld [vmem:[%s5568_s13 + $0x18] sm:$0xff]   ;;  %v4595_v14 = vld [vmem:[%s5568_s13 + $0x50] sm:$0xff]  }
 0x3d2   :  { %v2636_v60 = vcombine.high %v2613_v19, %v2620_v20  ;;  %v2672_v22 = vcombine.low %v2599_v4, %v2601_v13  ;;  %v2635_v23 = vcombine.low %v2613_v19, %v2620_v20  ;;  %v4596_v3 = vld [vmem:[%s5568_s13 + $0x90] sm:$0xff]   ;;  %v4598_v16 = vld [vmem:[%s5568_s13 + $0x48] sm:$0xff]   ;;  %v4601_v38 = vld [vmem:[%s5568_s13 + $0x40] sm:$0xff]  }
 0x3d3   :  { %v2634_v25 = vrot.slane %v2606_v7, %v4736_v11  ;;  %v2679_v10 = vrot.slane %v2670_v8, %v4736_v11  ;;  %v2686_v26 = vrot.slane %v2671_v21, %v4736_v11  ;;  %v4599_v18 = vld [vmem:[%s5568_s13 + $0x88] sm:$0xff]   ;;  %v4602_v58 = vld [vmem:[%s5568_s13 + $0x80] sm:$0xff]  }
 0x3d4   :  { %v2693_v27 = vrot.slane %v2672_v22, %v4736_v11  ;;  %v2652_v33 = vrot.slane %v2636_v60, %v4736_v11  ;;  %v2645_v36 = vrot.slane %v2635_v23, %v4736_v11  ;;  %v4600_v17 = vld [vmem:[%s5568_s13 + $0x8] sm:$0xff]   ;;  %v4603_v4 = vld [vmem:[%s5568_s13] sm:$0xff]  }
 0x3d5   :  { %v2638_v28 = vcombine.high %v2627_v24, %v2634_v25  ;;  %v2695_v29 = vcombine.high %v2679_v10, %v2686_v26  ;;  %v2637_v31 = vcombine.low %v2627_v24, %v2634_v25  ;;  %v2694_v32 = vcombine.low %v2679_v10, %v2686_v26 }
 0x3d6   :  { %v2696_v35 = vcombine.high %v2693_v27, %v2693_v27  ;;  %v2717_v37 = vrot.slane %v2693_v27, %v4736_v11 }
 0x3d7   :  { %v2666_v39 = vrot.slane %v2638_v28, %v4736_v11  ;;  %v2710_v40 = vrot.slane %v2695_v29, %v4736_v11  ;;  %v2659_v41 = vrot.slane %v2637_v31, %v4736_v11  ;;  %v2703_v42 = vrot.slane %v2694_v32, %v4736_v11 }
 0x3d8   :  { %v2724_v43 = vrot.slane %v2696_v35, %v4736_v11 }
 0x3d9   :  { %v2669_v44 = vcombine.low %v2652_v33, %v2666_v39  ;;  %v2668_v45 = vcombine.high %v2645_v36, %v2659_v41  ;;  %v2726_v46 = vcombine.high %v2703_v42, %v2717_v37  ;;  %v2667_v47 = vcombine.low %v2645_v36, %v2659_v41 }
 0x3da   :  { %v2727_v5 = vcombine.low %v2710_v40, %v2724_v43  ;;  %v2725_v48 = vcombine.low %v2703_v42, %v2717_v37 }
 0x3db   :  { %v2736_v49 = vpack.c.bf16 %v2726_v46, %v2668_v45 }
 0x3dc   :  { %v2735_v51 = vpack.c.bf16 %v2727_v5, %v2669_v44  ;;  %v2734_v52 = vpack.c.bf16 %v2725_v48, %v2667_v47 }
 0x3dd   :  { %4452 = vmatmul.mubr.bf16.vlgmr.msra.gmra.mxu0 %v2736_v49 }
 0x3de   :  { %2913 = vmatprep.mubr.bf16.mxu1 %v2735_v51  ;;  %4471 = vmatprep.mubr.msk.bf16.mxu0 %vm4625_vm11, %v4624_v34 }
 0x3df   :  { %2914 = vmatmul.mubr.bf16.vlgmr.msra.gmra.mxu1 %v2734_v52  ;;  %4456 = vmatpush3.bf16.msra.mxu0 %v4581_v55  ;;  %v2357_v52 = vld [vmem:[%s5569_s11] sm:$0x1] }
 0x3e0   :  { %4370 = vmatpush3.bf16.msra.mxu1 %v4582_v54  ;;  %4457 = vmatprep.subr.bf16.mxu0 %v4624_v34 }
 0x3e1   :  { %4371 = vmatprep.subr.bf16.mxu1 %v4583_v56  ;;  %v4214_v56 = vld [vmem:[%s5570_s12] ss:$0 sm:$0xff] }
 0x3e3   :  { %4458 = vmatpush3.bf16.msra.mxu0 %v4584_v57 }
 0x3e4   :  { %4372 = vmatpush3.bf16.msra.mxu1 %v4585_v61  ;;  %4459 = vmatprep.subr.bf16.mxu0 %v4624_v34 }
 0x3e5   :  { %4373 = vmatprep.subr.bf16.mxu1 %v4586_v62 }
 0x3e7   :  { %4460 = vmatpush3.bf16.msra.mxu0 %v4587_v0 }
 0x3e8   :  { %4374 = vmatpush3.bf16.msra.mxu1 %v4588_v6  ;;  %4461 = vmatprep.subr.bf16.mxu0 %v4624_v34 }
 0x3e9   :  { %4375 = vmatprep.subr.bf16.mxu1 %v4589_v59 }
 0x3eb   :  { %4462 = vmatpush3.bf16.msra.mxu0 %v4590_v63 }
 0x3ec   :  { %4376 = vmatpush3.bf16.msra.mxu1 %v4591_v1  ;;  %4463 = vmatprep.subr.bf16.mxu0 %v4624_v34 }
 0x3ed   :  { %4377 = vmatprep.subr.bf16.mxu1 %v4592_v2 }
 0x3ef   :  { %4464 = vmatpush3.bf16.msra.mxu0 %v4593_v12 }
 0x3f0   :  { %4378 = vmatpush3.bf16.msra.mxu1 %v4594_v9  ;;  %4465 = vmatprep.subr.bf16.mxu0 %v4624_v34 }
 0x3f1   :  { %4379 = vmatprep.subr.bf16.mxu1 %v4595_v14 }
 0x3f3   :  { %4466 = vmatpush3.bf16.msra.mxu0 %v4596_v3 }
 0x3f4   :  { %4380 = vmatpush3.bf16.msra.mxu1 %v4597_v15  ;;  %4467 = vmatprep.subr.bf16.mxu0 %v4624_v34 }
 0x3f5   :  { %4381 = vmatprep.subr.bf16.mxu1 %v4598_v16 }
 0x3f7   :  { %4468 = vmatpush3.bf16.msra.mxu0 %v4599_v18 }
 0x3f8   :  { %4382 = vmatpush3.bf16.msra.mxu1 %v4600_v17  ;;  %4469 = vmatprep.subr.bf16.mxu0 %v4624_v34 }
 0x3f9   :  { %4383 = vmatprep.subr.bf16.mxu1 %v4601_v38 }
 0x3fb   :  { %4470 = vmatpush3.bf16.msra.mxu0 %v4602_v58 }
 0x3fc   :  { %4384 = vmatpush3.bf16.msra.mxu1 %v4603_v4 }
 0x3fd   :  { %4475 = vmatprep.subr.bf16.mxu1 %v4624_v34 }
 0x49d   :  { %v2956_v13 = vpop.f32.mrf.mxu0 }
 0x49f   :  { %v4354_v19 = vpop.f32.mrf.mxu1  ;;  %v4453_v20 = vpop.f32.mrf.mxu0 }
 0x4a1   :  { %v4355_v7 = vpop.f32.mrf.mxu1  ;;  %v2959_v8 = vpop.f32.mrf.mxu0 }
 0x4a2   :  { %v4356_v22 = vadd.f32 %v4355_v7, %v4354_v19 }
 0x4a3   :  { %v4357_v21 = vpop.f32.mrf.mxu1  ;;  %v4454_v60 = vpop.f32.mrf.mxu0 }
 0x4a4   :  { %v2957_v10 = vadd.f32 %v4356_v22, %v2956_v13 }
 0x4a5   :  { %v4358_v23 = vpop.f32.mrf.mxu1 }
 0x4a6   :  { %v4359_v24 = vadd.f32 %v4358_v23, %v4357_v21 }
 0x4a8   :  { %v2960_v25 = vadd.f32 %v4359_v24, %v2959_v8 }
 0x4aa   :  { %v2963_v26 = vsel %vm578_vm4, %v2960_v25, 0.0 }
 0x4ab   :  { %v2964_v27 = vadd.f32 %v2963_v26, %v2957_v10 }
 0x4ad   :  { %v2965_v28 = vrot.slane %v2964_v27, 4 }
 0x4af   :  { %v2966_v29 = vadd.f32 %v2965_v28, %v2964_v27 }
 0x4b1   :  { %v2967_v31 = vrot.slane %v2966_v29, 2 }
 0x4b3   :  { %v2968_v32 = vadd.f32 %v2967_v31, %v2966_v29 }
 0x4b5   :  { %v2969_v33 = vrot.slane %v2968_v32, 1 }
 0x4b7   :  { %v2970_v35 = vadd.f32 %v2969_v33, %v2968_v32 }
 0x4b9   :  { %v2971_v36 = vmul.f32 0.071428575, %v2970_v35 }
 0x4bb   :  { %v2972_v37 = vsub.f32 %v2957_v10, %v2971_v36  ;;  %v2973_v39 = vsub.f32 %v2960_v25, %v2971_v36 }
 0x4bd   :  { %v2974_v40 = vmul.f32 %v2972_v37, %v2972_v37  ;;  %v2975_v41 = vmul.f32 %v2973_v39, %v2973_v39 }
 0x4bf   :  { %v2976_v42 = vsel %vm578_vm4, %v2975_v41, 0.0 }
 0x4c0   :  { %v2977_v43 = vadd.f32 %v2976_v42, %v2974_v40 }
 0x4c2   :  { %v2978_v44 = vrot.slane %v2977_v43, 4 }
 0x4c4   :  { %v2979_v45 = vadd.f32 %v2978_v44, %v2977_v43 }
 0x4c6   :  { %v2980_v46 = vrot.slane %v2979_v45, 2 }
 0x4c8   :  { %v2981_v47 = vadd.f32 %v2980_v46, %v2979_v45 }
 0x4ca   :  { %v2982_v5 = vrot.slane %v2981_v47, 1 }
 0x4cc   :  { %v2983_v48 = vadd.f32 %v2982_v5, %v2981_v47 }
 0x4ce   :  { %v2984_v49 = vmul.f32 0.071428575, %v2983_v48 }
 0x4d0   :  { %v2985_v51 = vadd.f32 1e-05, %v2984_v49 }
 0x4d2   :  { %4618 = vrsqrt.f32 %v2985_v51 }
 0x4df   :  { %v4619_v53 = vpop.eup %4618 }
 0x4e0   :  { %v2987_v55 = vmul.f32 %v4619_v53, %v2357_v52 }
 0x4e2   :  { %v2991_v54 = vrot.slane %v2987_v55, %v4838_v50 }
 0x4e4   :  { %v2992_v57 = vmul.f32 %v2991_v54, %v2972_v37  ;;  %v2993_v61 = vmul.f32 %v2991_v54, %v2973_v39 }
 0x4e6   :  { %v3000_v62 = vadd.f32 %v4214_v56, %v2992_v57  ;;  %v3001_v0 = vadd.f32 %v4214_v56, %v2993_v61 }
 0x4e8   :  { %v3002_v6 = vmax.f32 %v3000_v62, 0.0  ;;  %v3003_v59 = vmax.f32 %v3001_v0, 0.0 }
 0x4ea   :  { %v3006_v63 = vcombine.high %v3002_v6, %v3002_v6  ;;  %v3013_v1 = vrot.slane %v3002_v6, %v4736_v11  ;;  %v3055_v2 = vcombine.high %v3003_v59, %v3003_v59  ;;  %v3062_v12 = vrot.slane %v3003_v59, %v4736_v11 }
 0x4ec   :  { %v3020_v9 = vrot.slane %v3006_v63, %v4736_v11  ;;  %v3021_v14 = vcombine.high %v3013_v1, %v3013_v1  ;;  %v3029_v3 = vrot.slane %v3013_v1, %v4736_v11  ;;  %v3069_v15 = vrot.slane %v3055_v2, %v4736_v11 }
 0x4ed   :  { %v3070_v16 = vcombine.high %v3062_v12, %v3062_v12  ;;  %v3078_v18 = vrot.slane %v3062_v12, %v4736_v11 }
 0x4ee   :  { %v3022_v17 = vcombine.high %v3020_v9, %v3020_v9  ;;  %v3036_v38 = vrot.slane %v3020_v9, %v4736_v11  ;;  %v3043_v58 = vrot.slane %v3021_v14, %v4736_v11  ;;  %v3051_v4 = vcombine.high %v3029_v3, %v3029_v3 }
 0x4ef   :  { %v3071_v13 = vcombine.high %v3069_v15, %v3069_v15  ;;  %v3085_v19 = vrot.slane %v3069_v15, %v4736_v11  ;;  %v3092_v20 = vrot.slane %v3070_v16, %v4736_v11  ;;  %v3152_v7 = vcombine.low %v3029_v3, %v3029_v3 }
 0x4f0   :  { %v3050_v8 = vrot.slane %v3022_v17, %v4736_v11  ;;  %v3052_v21 = vcombine.high %v3036_v38, %v3036_v38  ;;  %v3053_v60 = vcombine.high %v3043_v58, %v3043_v58  ;;  %v3153_v22 = vcombine.low %v3043_v58, %v3051_v4 }
 0x4f1   :  { %v3099_v23 = vrot.slane %v3071_v13, %v4736_v11  ;;  %v3162_v24 = vrot.slane %v3152_v7, %v4736_v11  ;;  %v3202_v25 = vcombine.low %v3078_v18, %v3092_v20  ;;  %v4216_v10 = vcombine.high %v3078_v18, %v3092_v20 }
 0x4f2   :  { %v3154_v26 = vcombine.low %v3053_v60, %v3036_v38  ;;  %v3155_v27 = vcombine.low %v3050_v8, %v3052_v21  ;;  %v3169_v28 = vrot.slane %v3153_v22, %v4736_v11  ;;  %v4215_v29 = vcombine.high %v3050_v8, %v3050_v8 }
 0x4f3   :  { %v3204_v31 = vcombine.low %v3085_v19, %v3099_v23  ;;  %v3218_v32 = vrot.slane %v3202_v25, %v4736_v11  ;;  %v3225_v39 = vrot.slane %v4216_v10, %v4736_v11 }
 0x4f4   :  { %v3176_v33 = vrot.slane %v3154_v26, %v4736_v11  ;;  %v3183_v35 = vrot.slane %v3155_v27, %v4736_v11  ;;  %v3184_v36 = vcombine.low %v3162_v24, %v3169_v28  ;;  %v3211_v37 = vrot.slane %v4215_v29, %v4736_v11 }
 0x4f5   :  { %v3232_v40 = vrot.slane %v3204_v31, %v4736_v11 }
 0x4f6   :  { %v3185_v41 = vcombine.low %v3176_v33, %v3183_v35  ;;  %v3233_v42 = vcombine.low %v3211_v37, %v3218_v32  ;;  %v3192_v44 = vrot.slane %v3184_v36, %v4736_v11 }
 0x4f7   :  { %v3234_v43 = vcombine.low %v3225_v39, %v3232_v40 }
 0x4f8   :  { %v3199_v45 = vrot.slane %v3185_v41, %v4736_v11  ;;  %v3241_v46 = vrot.slane %v3233_v42, %v4736_v11 }
 0x4f9   :  { %v3248_v47 = vrot.slane %v3234_v43, %v4736_v11 }
 0x4fa   :  { %v3200_v5 = vcombine.low %v3192_v44, %v3199_v45 }
 0x4fb   :  { %v3249_v48 = vcombine.low %v3241_v46, %v3248_v47 }
 0x4fc   :  { %v3252_v49 = vsel %vm552_vm2, 0.0, %v3200_v5 }
 0x4fd   :  { %v3253_v51 = vsel %vm552_vm2, 0.0, %v3249_v48  ;;  %v3256_v52 = vrot.slane %v3252_v49, 1  ;;  %v3258_v53 = vrot.slane %v3252_v49, 2 }
 0x4fe   :  { %v3257_v55 = vrot.slane %v3253_v51, 1  ;;  %v3260_v54 = vrot.slane %v3253_v51, 2 }
 0x4ff   :  { %v3259_v56 = vsel %vm578_vm4, %v3258_v53, %v5291_v30  ;;  %v3262_v57 = vcombine.low %v3252_v49, %v3256_v52  ;;  %v3263_v61 = vcombine.high %v3252_v49, %v3256_v52 }
 0x500   :  { %v3261_v62 = vsel %vm578_vm4, %v3260_v54, %v5291_v30  ;;  %v3264_v0 = vcombine.high %v3259_v56, %v3259_v56  ;;  %v3285_v6 = vrot.slane %v3259_v56, %v4736_v11  ;;  %v3328_v59 = vcombine.low %v3253_v51, %v3257_v55 }
 0x501   :  { %v3271_v63 = vrot.slane %v3262_v57, %v4736_v11  ;;  %v3278_v1 = vrot.slane %v3263_v61, %v4736_v11  ;;  %v3329_v2 = vcombine.high %v3253_v51, %v3257_v55  ;;  %v3330_v12 = vcombine.high %v3261_v62, %v3261_v62 }
 0x502   :  { %v3292_v9 = vrot.slane %v3264_v0, %v4736_v11  ;;  %v3337_v14 = vrot.slane %v3328_v59, %v4736_v11  ;;  %v3351_v3 = vrot.slane %v3261_v62, %v4736_v11 }
 0x503   :  { %v3293_v15 = vcombine.low %v3271_v63, %v3285_v6  ;;  %v3294_v16 = vcombine.high %v3271_v63, %v3285_v6  ;;  %v3344_v30 = vrot.slane %v3329_v2, %v4736_v11  ;;  %v3358_v18 = vrot.slane %v3330_v12, %v4736_v11 }
 0x504   :  { %v3295_v17 = vcombine.low %v3278_v1, %v3292_v9  ;;  %v3296_v38 = vcombine.high %v3278_v1, %v3292_v9  ;;  %v3359_v58 = vcombine.low %v3337_v14, %v3351_v3  ;;  %v3360_v4 = vcombine.high %v3337_v14, %v3351_v3  ;;  %v4604_v3 = vld [vmem:[%s5571_s16 + $0x38] sm:$0xff]  }
 0x505   :  { %v3303_v13 = vrot.slane %v3293_v15, %v4736_v11  ;;  %v3317_v19 = vrot.slane %v3294_v16, %v4736_v11  ;;  %v3361_v20 = vcombine.low %v3344_v30, %v3358_v18  ;;  %v3362_v7 = vcombine.high %v3344_v30, %v3358_v18  ;;  %v4605_v15 = vld [vmem:[%s5571_s16 + $0x30] sm:$0xff]   ;;  %v4606_v16 = vld [vmem:[%s5571_s16 + $0x28] sm:$0xff]   ;;  %v4607_v30 = vld [vmem:[%s5571_s16 + $0x20] sm:$0xff]  }
 0x506   :  { %v3310_v8 = vrot.slane %v3295_v17, %v4736_v11  ;;  %v3324_v21 = vrot.slane %v3296_v38, %v4736_v11  ;;  %v3369_v60 = vrot.slane %v3359_v58, %v4736_v11  ;;  %v3383_v22 = vrot.slane %v3360_v4, %v4736_v11  ;;  %v4608_v18 = vld [vmem:[%s5571_s16 + $0x18] sm:$0xff]   ;;  %v4609_v17 = vld [vmem:[%s5571_s16 + $0x10] sm:$0xff]   ;;  %v4610_v38 = vld [vmem:[%s5571_s16 + $0x8] sm:$0xff]  }
 0x507   :  { %v3376_v23 = vrot.slane %v3361_v20, %v4736_v11  ;;  %v3394_v24 = vcombine.low %v3303_v13, %v3317_v19  ;;  %v4217_v25 = vcombine.high %v3303_v13, %v3317_v19  ;;  %v3390_v29 = vrot.slane %v3362_v7, %v4736_v11  ;;  %v4611_v58 = vld [vmem:[%s5571_s16] sm:$0xff]  }
 0x508   :  { %v3326_v10 = vcombine.high %v3310_v8, %v3310_v8  ;;  %v3391_v26 = vcombine.high %v3369_v60, %v3369_v60  ;;  %v3393_v27 = vcombine.high %v3383_v22, %v3383_v22  ;;  %v3396_v28 = vcombine.low %v3310_v8, %v3324_v21 }
 0x509   :  { %v3392_v31 = vcombine.high %v3376_v23, %v3376_v23  ;;  %v3404_v32 = vrot.slane %v3394_v24, %v4736_v11  ;;  %v3411_v33 = vrot.slane %v4217_v25, %v4736_v11 }
 0x50a   :  { %v3397_v35 = vcombine.low %v3326_v10, %v3369_v60  ;;  %v3461_v36 = vcombine.low %v3383_v22, %v3391_v26  ;;  %v3462_v37 = vcombine.low %v3393_v27, %v3376_v23  ;;  %v3418_v42 = vrot.slane %v3396_v28, %v4736_v11 }
 0x50b   :  { %v3427_v39 = vcombine.high %v3404_v32, %v3411_v33  ;;  %v3463_v40 = vcombine.low %v3390_v29, %v3392_v31  ;;  %v3426_v41 = vcombine.low %v3404_v32, %v3411_v33 }
 0x50c   :  { %v3425_v43 = vrot.slane %v3397_v35, %v4736_v11  ;;  %v3470_v44 = vrot.slane %v3461_v36, %v4736_v11  ;;  %v3477_v45 = vrot.slane %v3462_v37, %v4736_v11 }
 0x50d   :  { %v3484_v46 = vrot.slane %v3463_v40, %v4736_v11  ;;  %v3443_v51 = vrot.slane %v3427_v39, %v4736_v11  ;;  %v3436_v53 = vrot.slane %v3426_v41, %v4736_v11 }
 0x50e   :  { %v3429_v47 = vcombine.high %v3418_v42, %v3425_v43  ;;  %v3486_v5 = vcombine.high %v3470_v44, %v3477_v45  ;;  %v3428_v48 = vcombine.low %v3418_v42, %v3425_v43  ;;  %v3485_v49 = vcombine.low %v3470_v44, %v3477_v45 }
 0x50f   :  { %v3487_v52 = vcombine.high %v3484_v46, %v3484_v46  ;;  %v3508_v55 = vrot.slane %v3484_v46, %v4736_v11 }
 0x510   :  { %v3457_v54 = vrot.slane %v3429_v47, %v4736_v11  ;;  %v3501_v56 = vrot.slane %v3486_v5, %v4736_v11  ;;  %v3450_v57 = vrot.slane %v3428_v48, %v4736_v11  ;;  %v3494_v61 = vrot.slane %v3485_v49, %v4736_v11  ;;  %v3150_v49 = vld [vmem:[%s5572_s14] sm:$0x1] }
 0x511   :  { %v3515_v62 = vrot.slane %v3487_v52, %v4736_v11 }
 0x512   :  { %v3460_v0 = vcombine.low %v3443_v51, %v3457_v54  ;;  %v3459_v6 = vcombine.high %v3436_v53, %v3450_v57  ;;  %v3517_v59 = vcombine.high %v3494_v61, %v3508_v55  ;;  %v3458_v63 = vcombine.low %v3436_v53, %v3450_v57 }
 0x513   :  { %v3518_v1 = vcombine.low %v3501_v56, %v3515_v62  ;;  %v3516_v2 = vcombine.low %v3494_v61, %v3508_v55  ;;  %v4242_v55 = vld [vmem:[%s5573_s15] ss:$0 sm:$0xff] }
 0x514   :  { %v3527_v12 = vpack.c.bf16 %v3517_v59, %v3459_v6  ;;  %v4243_v59 = vld [vmem:[%s5574_s17] ss:$0 sm:$0xff] }
 0x515   :  { %v3526_v9 = vpack.c.bf16 %v3518_v1, %v3460_v0  ;;  %v3525_v14 = vpack.c.bf16 %v3516_v2, %v3458_v63 }
 0x516   :  { %4472 = vmatmul.mubr.bf16.vlgmr.msra.gmra.mxu0 %v3527_v12 }
 0x517   :  { %3704 = vmatprep.mubr.bf16.mxu1 %v3526_v9 }
 0x518   :  { %3705 = vmatmul.mubr.bf16.vlgmr.msra.gmra.mxu1 %v3525_v14 }
 0x519   :  { %4491 = vmatprep.mubr.msk.bf16.mxu1 %vm4625_vm11, %v4624_v34  ;;  %4476 = vmatpush3.bf16.msra.mxu1 %v4604_v3 }
 0x51a   :  { %4477 = vmatprep.subr.bf16.mxu1 %v4624_v34 }
 0x51d   :  { %4478 = vmatpush3.bf16.msra.mxu1 %v4605_v15 }
 0x51e   :  { %4479 = vmatprep.subr.bf16.mxu1 %v4624_v34 }
 0x521   :  { %4480 = vmatpush3.bf16.msra.mxu1 %v4606_v16 }
 0x522   :  { %4481 = vmatprep.subr.bf16.mxu1 %v4624_v34 }
 0x525   :  { %4482 = vmatpush3.bf16.msra.mxu1 %v4607_v30 }
 0x526   :  { %4483 = vmatprep.subr.bf16.mxu1 %v4624_v34 }
 0x529   :  { %4484 = vmatpush3.bf16.msra.mxu1 %v4608_v18 }
 0x52a   :  { %4485 = vmatprep.subr.bf16.mxu1 %v4624_v34 }
 0x52d   :  { %4486 = vmatpush3.bf16.msra.mxu1 %v4609_v17 }
 0x52e   :  { %4487 = vmatprep.subr.bf16.mxu1 %v4624_v34 }
 0x531   :  { %4488 = vmatpush3.bf16.msra.mxu1 %v4610_v38 }
 0x532   :  { %4489 = vmatprep.subr.bf16.mxu1 %v4624_v34 }
 0x535   :  { %4490 = vmatpush3.bf16.msra.mxu1 %v4611_v58 }
 0x5d6   :  { %v3747_v4 = vpop.f32.mrf.mxu0 }
 0x5d8   :  { %v4385_v13 = vpop.f32.mrf.mxu1  ;;  %v4473_v19 = vpop.f32.mrf.mxu0 }
 0x5da   :  { %v4386_v20 = vpop.f32.mrf.mxu1  ;;  %v3750_v7 = vpop.f32.mrf.mxu0 }
 0x5db   :  { %v4387_v60 = vadd.f32 %v4386_v20, %v4385_v13 }
 0x5dc   :  { %v4388_v8 = vpop.f32.mrf.mxu1  ;;  %v4474_v21 = vpop.f32.mrf.mxu0 }
 0x5dd   :  { %v3748_v25 = vadd.f32 %v4387_v60, %v3747_v4 }
 0x5de   :  { %v4389_v22 = vpop.f32.mrf.mxu1 }
 0x5df   :  { %v4390_v23 = vadd.f32 %v4389_v22, %v4388_v8 }
 0x5e1   :  { %v3751_v24 = vadd.f32 %v4390_v23, %v3750_v7 }
 0x5e3   :  { %v3754_v10 = vsel %vm578_vm4, %v3751_v24, 0.0 }
 0x5e4   :  { %v3755_v34 = vadd.f32 %v3754_v10, %v3748_v25 }
 0x5e6   :  { %v3756_v26 = vrot.slane %v3755_v34, 4 }
 0x5e8   :  { %v3757_v27 = vadd.f32 %v3756_v26, %v3755_v34 }
 0x5ea   :  { %v3758_v28 = vrot.slane %v3757_v27, 2 }
 0x5ec   :  { %v3759_v29 = vadd.f32 %v3758_v28, %v3757_v27 }
 0x5ee   :  { %v3760_v31 = vrot.slane %v3759_v29, 1 }
 0x5f0   :  { %v3761_v32 = vadd.f32 %v3760_v31, %v3759_v29 }
 0x5f2   :  { %v3762_v33 = vmul.f32 0.071428575, %v3761_v32 }
 0x5f4   :  { %v3763_v35 = vsub.f32 %v3748_v25, %v3762_v33  ;;  %v3764_v36 = vsub.f32 %v3751_v24, %v3762_v33 }
 0x5f6   :  { %v3765_v37 = vmul.f32 %v3763_v35, %v3763_v35  ;;  %v3766_v39 = vmul.f32 %v3764_v36, %v3764_v36 }
 0x5f8   :  { %v3767_v40 = vsel %vm578_vm4, %v3766_v39, 0.0 }
 0x5f9   :  { %v3768_v41 = vadd.f32 %v3767_v40, %v3765_v37 }
 0x5fb   :  { %v3769_v42 = vrot.slane %v3768_v41, 4 }
 0x5fd   :  { %v3770_v43 = vadd.f32 %v3769_v42, %v3768_v41 }
 0x5ff   :  { %v3771_v44 = vrot.slane %v3770_v43, 2 }
 0x601   :  { %v3772_v45 = vadd.f32 %v3771_v44, %v3770_v43 }
 0x603   :  { %v3773_v46 = vrot.slane %v3772_v45, 1 }
 0x605   :  { %v3774_v47 = vadd.f32 %v3773_v46, %v3772_v45 }
 0x607   :  { %v3775_v5 = vmul.f32 0.071428575, %v3774_v47 }
 0x609   :  { %v3776_v48 = vadd.f32 1e-05, %v3775_v5 }
 0x60b   :  { %4620 = vrsqrt.f32 %v3776_v48 }
 0x618   :  { %v4621_v51 = vpop.eup %4620 }
 0x619   :  { %v3778_v52 = vmul.f32 %v4621_v51, %v3150_v49 }
 0x61b   :  { %v3782_v53 = vrot.slane %v3778_v52, %v4838_v50 }
 0x61d   :  { %v3783_v54 = vmul.f32 %v3782_v53, %v3763_v35  ;;  %v3784_v56 = vmul.f32 %v3782_v53, %v3764_v36 }
 0x61f   :  { %v3792_v57 = vadd.f32 %v4242_v55, %v3784_v56  ;;  %v3791_v61 = vadd.f32 %v4242_v55, %v3783_v54 }
 0x621   :  { %v3794_v62 = vmax.f32 %v3792_v57, 0.0  ;;  %v3793_v0 = vmax.f32 %v3791_v61, 0.0 }
 0x623   :  { %v3812_v6 = vpack.c.bf16 %v3794_v62, %v3793_v0 }
 0x625   :  { %4492 = vmatmul.mubr.bf16.vlgmr.msra.gmra.mxu1 %v3812_v6 }
 0x6e5   :  { %v3901_v63 = vpop.f32.mrf.mxu1 }
 0x6e6   :  { %v3902_v1 = vadd.f32 %v4243_v59, %v3901_v63 }
 0x6e7   :  { %v4493_v2 = vpop.f32.mrf.mxu1 }
 0x6e8   :  { %v3910_v50 = vcombine.high %v3902_v1, %v3902_v1  ;;  %v3917_v12 = vrot.slane %v3902_v1, %v4736_v11 }
 0x6e9   :  { %v3904_v9 = vpop.f32.mrf.mxu1 }
 0x6ea   :  { %v3924_v14 = vrot.slane %v3910_v50, %v4736_v11  ;;  %v3925_v3 = vcombine.high %v3917_v12, %v3917_v12  ;;  %v3905_v15 = vadd.f32 %v4243_v59, %v3904_v9  ;;  %v3933_v16 = vrot.slane %v3917_v12, %v4736_v11 }
 0x6eb   :  { %v4494_v30 = vpop.f32.mrf.mxu1 }
 0x6ec   :  { %v3926_v18 = vcombine.high %v3924_v14, %v3924_v14  ;;  %v3940_v17 = vrot.slane %v3924_v14, %v4736_v11  ;;  %v3947_v38 = vrot.slane %v3925_v3, %v4736_v11  ;;  %v3959_v58 = vcombine.high %v3905_v15, %v3905_v15 }
 0x6ed   :  { %v3966_v4 = vrot.slane %v3905_v15, %v4736_v11 }
 0x6ee   :  { %v3954_v13 = vrot.slane %v3926_v18, %v4736_v11  ;;  %v3956_v19 = vcombine.high %v3940_v17, %v3940_v17  ;;  %v4006_v20 = vcombine.low %v3933_v16, %v3947_v38  ;;  %v4252_v7 = vcombine.high %v3933_v16, %v3947_v38 }
 0x6ef   :  { %v3973_v8 = vrot.slane %v3959_v58, %v4736_v11  ;;  %v3974_v21 = vcombine.high %v3966_v4, %v3966_v4  ;;  %v3982_v60 = vrot.slane %v3966_v4, %v4736_v11 }
 0x6f0   :  { %v4008_v22 = vcombine.low %v3940_v17, %v3954_v13  ;;  %v4015_v23 = vrot.slane %v4006_v20, %v4736_v11  ;;  %v4022_v24 = vrot.slane %v4252_v7, %v4736_v11  ;;  %v3958_v25 = vcombine.high %v3954_v13, %v3954_v13 }
 0x6f1   :  { %v3975_v10 = vcombine.high %v3973_v8, %v3973_v8  ;;  %v3996_v34 = vrot.slane %v3974_v21, %v4736_v11  ;;  %v4036_v27 = vrot.slane %v3956_v19, %v4736_v11  ;;  %v4004_v29 = vcombine.high %v3982_v60, %v3982_v60 }
 0x6f2   :  { %v4029_v26 = vrot.slane %v4008_v22, %v4736_v11  ;;  %v4037_v28 = vcombine.low %v4015_v23, %v4022_v24  ;;  %v3989_v31 = vrot.slane %v3973_v8, %v4736_v11  ;;  %v4054_v35 = vcombine.low %v3958_v25, %v3982_v60 }
 0x6f3   :  { %v4003_v32 = vrot.slane %v3975_v10, %v4736_v11  ;;  %v4005_v33 = vcombine.high %v3996_v34, %v3996_v34  ;;  %v4055_v37 = vcombine.low %v3996_v34, %v4004_v29 }
 0x6f4   :  { %v4038_v36 = vcombine.low %v4029_v26, %v4036_v27  ;;  %v4063_v40 = vrot.slane %v4054_v35, %v4736_v11  ;;  %v4045_v41 = vrot.slane %v4037_v28, %v4736_v11 }
 0x6f5   :  { %v4056_v39 = vcombine.low %v4005_v33, %v3989_v31  ;;  %v4070_v43 = vrot.slane %v4055_v37, %v4736_v11  ;;  %v4084_v45 = vrot.slane %v4003_v32, %v4736_v11 }
 0x6f6   :  { %v4052_v42 = vrot.slane %v4038_v36, %v4736_v11 }
 0x6f7   :  { %v4077_v44 = vrot.slane %v4056_v39, %v4736_v11  ;;  %v4085_v47 = vcombine.low %v4063_v40, %v4070_v43 }
 0x6f8   :  { %v4053_v46 = vcombine.low %v4045_v41, %v4052_v42 }
 0x6f9   :  { %v4086_v5 = vcombine.low %v4077_v44, %v4084_v45  ;;  %v4093_v48 = vrot.slane %v4085_v47, %v4736_v11 }
 0x6fa   :  { %4105 = vst.msk [vmem:[%s5575_s18] sm:$0x7f] %vm4104_vm12, %v4053_v46 }
 0x6fb   :  { %v4100_v49 = vrot.slane %v4086_v5, %v4736_v11 }
 0x6fd   :  { %v4101_v51 = vcombine.low %v4093_v48, %v4100_v49 }
 0x6ff   :  { %4106 = vst.msk [vmem:[%s5575_s18 + $0x8] sm:$0x7f] %vm4104_vm12, %v4101_v51 }

</bundles_post_ra>
